<compile_context>
chip_gen: v7x
topology: tpu7x:2x2x1
jax: 0.10.0
libtpu: 0.0.40
codegen_flags: <defaults>
</compile_context>

<pallas_src>
import functools

import jax
import jax.numpy as jnp
from jax.experimental import pallas as pl
from jax.experimental.pallas import tpu as pltpu

BN_EPS = 1e-5
NEG_SLOPE = 0.01  # nn.LeakyReLU default


def _bn_leaky(z, gamma, beta):
    """Fused batch-stat BatchNorm1d (affine) + LeakyReLU, all in f32."""
    mean = jnp.mean(z, axis=0, keepdims=True)
    var = jnp.mean((z - mean) ** 2, axis=0, keepdims=True)  # biased variance
    scale = gamma * jax.lax.rsqrt(var + BN_EPS)              # (1, H)
    shift = beta - mean * scale                              # (1, H)
    h = z * scale + shift
    return jnp.maximum(h, NEG_SLOPE * h)


def dqn_kernel(x_ref,
               wi_ref, gi_ref, bti_ref,
               ws_ref, gs_ref, bts_ref,
               wf_ref, bf_ref,
               out_ref, *, num_repeats):
    # x / weights arrive as bf16; matmuls accumulate in f32 on the MXU.
    x = x_ref[...]

    # initial block: Linear (bias cancelled by BN) -> BN -> LeakyReLU
    z = jnp.dot(x, wi_ref[...], preferred_element_type=jnp.float32)
    h = _bn_leaky(z, gi_ref[...], bti_ref[...])

    # SubModule blocks (dropout = identity); tiny static unrolled loop.
    for i in range(num_repeats):
        z = jnp.dot(h.astype(jnp.bfloat16), ws_ref[i],
                    preferred_element_type=jnp.float32)
        h = _bn_leaky(z, gs_ref[i], bts_ref[i])

    # final Linear keeps its bias (no BN after it).
    out_ref[...] = (jnp.dot(h.astype(jnp.bfloat16), wf_ref[...],
                            preferred_element_type=jnp.float32)
                    + bf_ref[...])


def dqn_forward(x, params, *, num_repeats):
    """x: [B, state_dim] or [state_dim]; returns [B, action_dim] (or [A])."""
    squeeze = (x.ndim == 1)
    if squeeze:
        x = x[None, :]  # mirrors x.unsqueeze(0)
        # Note: PyTorch BatchNorm1d in training mode errors for batch size 1;
        # here B=1 silently yields beta-only activations.
    B = x.shape[0]
    A = params["w_final"].shape[1]

    vmem = pl.BlockSpec(memory_space=pltpu.MemorySpace.VMEM)
    args = (
        x.astype(jnp.bfloat16),
        params["w_init"].astype(jnp.bfloat16),
        params["g_init"], params["beta_init"],
        params["w_sub"].astype(jnp.bfloat16),
        params["g_sub"], params["beta_sub"],
        params["w_final"].astype(jnp.bfloat16),
        params["b_final"],
    )

    out = pl.pallas_call(
        functools.partial(dqn_kernel, num_repeats=num_repeats),
        out_shape=jax.ShapeDtypeStruct((B, A), jnp.float32),
        in_specs=[vmem] * len(args),
        out_specs=vmem,
    )(*args)

    # mirrors .squeeze(0): only collapses when the leading dim is 1
    if squeeze or B == 1:
        out = jnp.squeeze(out, axis=0)
    return out


def reference_forward(x, params, *, num_repeats):
    """Pure-JAX reference mirroring the kernel's arithmetic path.

    Includes the pre-BN biases (full PyTorch parameterization) to demonstrate
    that dropping them in the kernel is exact: batch-mean subtraction cancels
    any per-feature constant.
    """
    if x.ndim == 1:
        x = x[None, :]
    xb = x.astype(jnp.bfloat16)
    z = jnp.dot(xb, params["w_init"].astype(jnp.bfloat16),
                preferred_element_type=jnp.float32) + params["b_init"]
    h = _bn_leaky(z, params["g_init"], params["beta_init"])
    for i in range(num_repeats):
        z = jnp.dot(h.astype(jnp.bfloat16),
                    params["w_sub"][i].astype(jnp.bfloat16),
                    preferred_element_type=jnp.float32) + params["b_sub"][i]
        h = _bn_leaky(z, params["g_sub"][i], params["beta_sub"][i])
    out = jnp.dot(h.astype(jnp.bfloat16),
                  params["w_final"].astype(jnp.bfloat16),
                  preferred_element_type=jnp.float32) + params["b_final"]
    if out.shape[0] == 1:
        out = jnp.squeeze(out, axis=0)
    return out


def init_params(key, state_dim, action_dim, hidden_dim, num_repeats):
    ks = jax.random.split(key, 8)
    scale_i = 1.0 / jnp.sqrt(state_dim)
    scale_h = 1.0 / jnp.sqrt(hidden_dim)
    return {
        "w_init": jax.random.uniform(ks[0], (state_dim, hidden_dim),
                                     jnp.float32, -scale_i, scale_i),
        "b_init": jax.random.uniform(ks[1], (1, hidden_dim),
                                     jnp.float32, -scale_i, scale_i),
        "g_init": jnp.ones((1, hidden_dim), jnp.float32),
        "beta_init": jnp.zeros((1, hidden_dim), jnp.float32),
        "w_sub": jax.random.uniform(ks[2], (num_repeats, hidden_dim, hidden_dim),
                                    jnp.float32, -scale_h, scale_h),
        "b_sub": jax.random.uniform(ks[3], (num_repeats, 1, hidden_dim),
                                    jnp.float32, -scale_h, scale_h),
        "g_sub": jnp.ones((num_repeats, 1, hidden_dim), jnp.float32),
        "beta_sub": jnp.zeros((num_repeats, 1, hidden_dim), jnp.float32),
        "w_final": jax.random.uniform(ks[4], (hidden_dim, action_dim),
                                      jnp.float32, -scale_h, scale_h),
        "b_final": jax.random.uniform(ks[5], (1, action_dim),
                                      jnp.float32, -scale_h, scale_h),
    }


if __name__ == "__main__":
    STATE_DIM, ACTION_DIM, HIDDEN_DIM, NUM_REPEATS = 16, 4, 32, 3
    BATCH = 128  # fills MXU rows; BN batch stats need B > 1 anyway

    key = jax.random.PRNGKey(0)
    k_x, k_p = jax.random.split(key)
    x = jax.random.normal(k_x, (BATCH, STATE_DIM), dtype=jnp.float32)
    params = init_params(k_p, STATE_DIM, ACTION_DIM, HIDDEN_DIM, NUM_REPEATS)

    out = dqn_forward(x, params, num_repeats=NUM_REPEATS)
    out = jax.block_until_ready(out)

    ref = reference_forward(x, params, num_repeats=NUM_REPEATS)
    assert out.shape == (BATCH, ACTION_DIM)
    assert jnp.allclose(out, ref, atol=1e-3, rtol=1e-3), "mismatch vs JAX reference"

    print("KERNEL_OK")
</pallas_src>

<mosaic_0001>
module attributes {stable_mosaic.version = 11 : i64} {
  func.func @dqn_kernel(%arg0: memref<128x16xbf16, #tpu.memory_space<vmem>>, %arg1: memref<16x32xbf16, #tpu.memory_space<vmem>>, %arg2: memref<1x32xf32, #tpu.memory_space<vmem>>, %arg3: memref<1x32xf32, #tpu.memory_space<vmem>>, %arg4: memref<3x32x32xbf16, #tpu.memory_space<vmem>>, %arg5: memref<3x1x32xf32, #tpu.memory_space<vmem>>, %arg6: memref<3x1x32xf32, #tpu.memory_space<vmem>>, %arg7: memref<32x4xbf16, #tpu.memory_space<vmem>>, %arg8: memref<1x4xf32, #tpu.memory_space<vmem>>, %arg9: memref<128x4xf32, #tpu.memory_space<vmem>>) attributes {dimension_semantics = [], scalar_prefetch = 0 : i64, scratch_operands = 0 : i64, tpu.core_type = #tpu.core_type<tc>} {
    %c0 = arith.constant 0 : index
    %c0_0 = arith.constant 0 : index
    %0 = vector.load %arg0[%c0, %c0_0] : memref<128x16xbf16, #tpu.memory_space<vmem>>, vector<128x16xbf16>
    %c0_1 = arith.constant 0 : index
    %c0_2 = arith.constant 0 : index
    %1 = vector.load %arg1[%c0_1, %c0_2] : memref<16x32xbf16, #tpu.memory_space<vmem>>, vector<16x32xbf16>
    %cst = arith.constant dense<0.000000e+00> : vector<128x32xf32>
    %2 = tpu.matmul %0, %1, %cst {dimension_numbers = #tpu.dot_dimension_numbers<[1], [0], [0], [1], [0, 0, 1, 1], [], []>} : vector<128x16xbf16>, vector<16x32xbf16>, vector<128x32xf32> -> vector<128x32xf32>
    %c0_3 = arith.constant 0 : index
    %c0_4 = arith.constant 0 : index
    %3 = vector.load %arg2[%c0_3, %c0_4] : memref<1x32xf32, #tpu.memory_space<vmem>>, vector<1x32xf32>
    %c0_5 = arith.constant 0 : index
    %c0_6 = arith.constant 0 : index
    %4 = vector.load %arg3[%c0_5, %c0_6] : memref<1x32xf32, #tpu.memory_space<vmem>>, vector<1x32xf32>
    %cst_7 = arith.constant dense<0.000000e+00> : vector<32xf32>
    %5 = vector.multi_reduction <add>, %2, %cst_7 [0] : vector<128x32xf32> to vector<32xf32>
    %6 = vector.shape_cast %5 : vector<32xf32> to vector<1x32xf32>
    %cst_8 = arith.constant 1.280000e+02 : f32
    %7 = vector.broadcast %cst_8 : f32 to vector<1x32xf32>
    %8 = arith.divf %6, %7 : vector<1x32xf32>
    %9 = vector.broadcast %8 : vector<1x32xf32> to vector<128x32xf32>
    %10 = arith.subf %2, %9 : vector<128x32xf32>
    %11 = arith.mulf %10, %10 : vector<128x32xf32>
    %cst_9 = arith.constant dense<0.000000e+00> : vector<32xf32>
    %12 = vector.multi_reduction <add>, %11, %cst_9 [0] : vector<128x32xf32> to vector<32xf32>
    %13 = vector.shape_cast %12 : vector<32xf32> to vector<1x32xf32>
    %cst_10 = arith.constant 1.280000e+02 : f32
    %14 = vector.broadcast %cst_10 : f32 to vector<1x32xf32>
    %15 = arith.divf %13, %14 : vector<1x32xf32>
    %cst_11 = arith.constant 9.99999974E-6 : f32
    %16 = vector.broadcast %cst_11 : f32 to vector<1x32xf32>
    %17 = arith.addf %15, %16 : vector<1x32xf32>
    %18 = math.rsqrt %17 : vector<1x32xf32>
    %19 = arith.mulf %3, %18 : vector<1x32xf32>
    %20 = arith.mulf %8, %19 : vector<1x32xf32>
    %21 = arith.subf %4, %20 : vector<1x32xf32>
    %22 = vector.broadcast %19 : vector<1x32xf32> to vector<128x32xf32>
    %23 = arith.mulf %2, %22 : vector<128x32xf32>
    %24 = vector.broadcast %21 : vector<1x32xf32> to vector<128x32xf32>
    %25 = arith.addf %23, %24 : vector<128x32xf32>
    %cst_12 = arith.constant 0.00999999977 : f32
    %26 = vector.broadcast %cst_12 : f32 to vector<128x32xf32>
    %27 = arith.mulf %26, %25 : vector<128x32xf32>
    %28 = arith.maximumf %25, %27 : vector<128x32xf32>
    %29 = arith.truncf %28 : vector<128x32xf32> to vector<128x32xbf16>
    %c0_13 = arith.constant 0 : index
    %c0_14 = arith.constant 0 : index
    %c0_15 = arith.constant 0 : index
    %30 = vector.load %arg4[%c0_13, %c0_14, %c0_15] : memref<3x32x32xbf16, #tpu.memory_space<vmem>>, vector<1x32x32xbf16>
    %31 = vector.shape_cast %30 : vector<1x32x32xbf16> to vector<32x32xbf16>
    %cst_16 = arith.constant dense<0.000000e+00> : vector<128x32xf32>
    %32 = tpu.matmul %29, %31, %cst_16 {dimension_numbers = #tpu.dot_dimension_numbers<[1], [0], [0], [1], [0, 0, 1, 1], [], []>} : vector<128x32xbf16>, vector<32x32xbf16>, vector<128x32xf32> -> vector<128x32xf32>
    %c0_17 = arith.constant 0 : index
    %c0_18 = arith.constant 0 : index
    %c0_19 = arith.constant 0 : index
    %33 = vector.load %arg5[%c0_17, %c0_18, %c0_19] : memref<3x1x32xf32, #tpu.memory_space<vmem>>, vector<1x1x32xf32>
    %34 = vector.shape_cast %33 : vector<1x1x32xf32> to vector<1x32xf32>
    %c0_20 = arith.constant 0 : index
    %c0_21 = arith.constant 0 : index
    %c0_22 = arith.constant 0 : index
    %35 = vector.load %arg6[%c0_20, %c0_21, %c0_22] : memref<3x1x32xf32, #tpu.memory_space<vmem>>, vector<1x1x32xf32>
    %36 = vector.shape_cast %35 : vector<1x1x32xf32> to vector<1x32xf32>
    %cst_23 = arith.constant dense<0.000000e+00> : vector<32xf32>
    %37 = vector.multi_reduction <add>, %32, %cst_23 [0] : vector<128x32xf32> to vector<32xf32>
    %38 = vector.shape_cast %37 : vector<32xf32> to vector<1x32xf32>
    %cst_24 = arith.constant 1.280000e+02 : f32
    %39 = vector.broadcast %cst_24 : f32 to vector<1x32xf32>
    %40 = arith.divf %38, %39 : vector<1x32xf32>
    %41 = vector.broadcast %40 : vector<1x32xf32> to vector<128x32xf32>
    %42 = arith.subf %32, %41 : vector<128x32xf32>
    %43 = arith.mulf %42, %42 : vector<128x32xf32>
    %cst_25 = arith.constant dense<0.000000e+00> : vector<32xf32>
    %44 = vector.multi_reduction <add>, %43, %cst_25 [0] : vector<128x32xf32> to vector<32xf32>
    %45 = vector.shape_cast %44 : vector<32xf32> to vector<1x32xf32>
    %cst_26 = arith.constant 1.280000e+02 : f32
    %46 = vector.broadcast %cst_26 : f32 to vector<1x32xf32>
    %47 = arith.divf %45, %46 : vector<1x32xf32>
    %cst_27 = arith.constant 9.99999974E-6 : f32
    %48 = vector.broadcast %cst_27 : f32 to vector<1x32xf32>
    %49 = arith.addf %47, %48 : vector<1x32xf32>
    %50 = math.rsqrt %49 : vector<1x32xf32>
    %51 = arith.mulf %34, %50 : vector<1x32xf32>
    %52 = arith.mulf %40, %51 : vector<1x32xf32>
    %53 = arith.subf %36, %52 : vector<1x32xf32>
    %54 = vector.broadcast %51 : vector<1x32xf32> to vector<128x32xf32>
    %55 = arith.mulf %32, %54 : vector<128x32xf32>
    %56 = vector.broadcast %53 : vector<1x32xf32> to vector<128x32xf32>
    %57 = arith.addf %55, %56 : vector<128x32xf32>
    %cst_28 = arith.constant 0.00999999977 : f32
    %58 = vector.broadcast %cst_28 : f32 to vector<128x32xf32>
    %59 = arith.mulf %58, %57 : vector<128x32xf32>
    %60 = arith.maximumf %57, %59 : vector<128x32xf32>
    %61 = arith.truncf %60 : vector<128x32xf32> to vector<128x32xbf16>
    %c1 = arith.constant 1 : index
    %c0_29 = arith.constant 0 : index
    %c0_30 = arith.constant 0 : index
    %62 = vector.load %arg4[%c1, %c0_29, %c0_30] : memref<3x32x32xbf16, #tpu.memory_space<vmem>>, vector<1x32x32xbf16>
    %63 = vector.shape_cast %62 : vector<1x32x32xbf16> to vector<32x32xbf16>
    %cst_31 = arith.constant dense<0.000000e+00> : vector<128x32xf32>
    %64 = tpu.matmul %61, %63, %cst_31 {dimension_numbers = #tpu.dot_dimension_numbers<[1], [0], [0], [1], [0, 0, 1, 1], [], []>} : vector<128x32xbf16>, vector<32x32xbf16>, vector<128x32xf32> -> vector<128x32xf32>
    %c1_32 = arith.constant 1 : index
    %c0_33 = arith.constant 0 : index
    %c0_34 = arith.constant 0 : index
    %65 = vector.load %arg5[%c1_32, %c0_33, %c0_34] : memref<3x1x32xf32, #tpu.memory_space<vmem>>, vector<1x1x32xf32>
    %66 = vector.shape_cast %65 : vector<1x1x32xf32> to vector<1x32xf32>
    %c1_35 = arith.constant 1 : index
    %c0_36 = arith.constant 0 : index
    %c0_37 = arith.constant 0 : index
    %67 = vector.load %arg6[%c1_35, %c0_36, %c0_37] : memref<3x1x32xf32, #tpu.memory_space<vmem>>, vector<1x1x32xf32>
    %68 = vector.shape_cast %67 : vector<1x1x32xf32> to vector<1x32xf32>
    %cst_38 = arith.constant dense<0.000000e+00> : vector<32xf32>
    %69 = vector.multi_reduction <add>, %64, %cst_38 [0] : vector<128x32xf32> to vector<32xf32>
    %70 = vector.shape_cast %69 : vector<32xf32> to vector<1x32xf32>
    %cst_39 = arith.constant 1.280000e+02 : f32
    %71 = vector.broadcast %cst_39 : f32 to vector<1x32xf32>
    %72 = arith.divf %70, %71 : vector<1x32xf32>
    %73 = vector.broadcast %72 : vector<1x32xf32> to vector<128x32xf32>
    %74 = arith.subf %64, %73 : vector<128x32xf32>
    %75 = arith.mulf %74, %74 : vector<128x32xf32>
    %cst_40 = arith.constant dense<0.000000e+00> : vector<32xf32>
    %76 = vector.multi_reduction <add>, %75, %cst_40 [0] : vector<128x32xf32> to vector<32xf32>
    %77 = vector.shape_cast %76 : vector<32xf32> to vector<1x32xf32>
    %cst_41 = arith.constant 1.280000e+02 : f32
    %78 = vector.broadcast %cst_41 : f32 to vector<1x32xf32>
    %79 = arith.divf %77, %78 : vector<1x32xf32>
    %cst_42 = arith.constant 9.99999974E-6 : f32
    %80 = vector.broadcast %cst_42 : f32 to vector<1x32xf32>
    %81 = arith.addf %79, %80 : vector<1x32xf32>
    %82 = math.rsqrt %81 : vector<1x32xf32>
    %83 = arith.mulf %66, %82 : vector<1x32xf32>
    %84 = arith.mulf %72, %83 : vector<1x32xf32>
    %85 = arith.subf %68, %84 : vector<1x32xf32>
    %86 = vector.broadcast %83 : vector<1x32xf32> to vector<128x32xf32>
    %87 = arith.mulf %64, %86 : vector<128x32xf32>
    %88 = vector.broadcast %85 : vector<1x32xf32> to vector<128x32xf32>
    %89 = arith.addf %87, %88 : vector<128x32xf32>
    %cst_43 = arith.constant 0.00999999977 : f32
    %90 = vector.broadcast %cst_43 : f32 to vector<128x32xf32>
    %91 = arith.mulf %90, %89 : vector<128x32xf32>
    %92 = arith.maximumf %89, %91 : vector<128x32xf32>
    %93 = arith.truncf %92 : vector<128x32xf32> to vector<128x32xbf16>
    %c2 = arith.constant 2 : index
    %c0_44 = arith.constant 0 : index
    %c0_45 = arith.constant 0 : index
    %94 = vector.load %arg4[%c2, %c0_44, %c0_45] : memref<3x32x32xbf16, #tpu.memory_space<vmem>>, vector<1x32x32xbf16>
    %95 = vector.shape_cast %94 : vector<1x32x32xbf16> to vector<32x32xbf16>
    %cst_46 = arith.constant dense<0.000000e+00> : vector<128x32xf32>
    %96 = tpu.matmul %93, %95, %cst_46 {dimension_numbers = #tpu.dot_dimension_numbers<[1], [0], [0], [1], [0, 0, 1, 1], [], []>} : vector<128x32xbf16>, vector<32x32xbf16>, vector<128x32xf32> -> vector<128x32xf32>
    %c2_47 = arith.constant 2 : index
    %c0_48 = arith.constant 0 : index
    %c0_49 = arith.constant 0 : index
    %97 = vector.load %arg5[%c2_47, %c0_48, %c0_49] : memref<3x1x32xf32, #tpu.memory_space<vmem>>, vector<1x1x32xf32>
    %98 = vector.shape_cast %97 : vector<1x1x32xf32> to vector<1x32xf32>
    %c2_50 = arith.constant 2 : index
    %c0_51 = arith.constant 0 : index
    %c0_52 = arith.constant 0 : index
    %99 = vector.load %arg6[%c2_50, %c0_51, %c0_52] : memref<3x1x32xf32, #tpu.memory_space<vmem>>, vector<1x1x32xf32>
    %100 = vector.shape_cast %99 : vector<1x1x32xf32> to vector<1x32xf32>
    %cst_53 = arith.constant dense<0.000000e+00> : vector<32xf32>
    %101 = vector.multi_reduction <add>, %96, %cst_53 [0] : vector<128x32xf32> to vector<32xf32>
    %102 = vector.shape_cast %101 : vector<32xf32> to vector<1x32xf32>
    %cst_54 = arith.constant 1.280000e+02 : f32
    %103 = vector.broadcast %cst_54 : f32 to vector<1x32xf32>
    %104 = arith.divf %102, %103 : vector<1x32xf32>
    %105 = vector.broadcast %104 : vector<1x32xf32> to vector<128x32xf32>
    %106 = arith.subf %96, %105 : vector<128x32xf32>
    %107 = arith.mulf %106, %106 : vector<128x32xf32>
    %cst_55 = arith.constant dense<0.000000e+00> : vector<32xf32>
    %108 = vector.multi_reduction <add>, %107, %cst_55 [0] : vector<128x32xf32> to vector<32xf32>
    %109 = vector.shape_cast %108 : vector<32xf32> to vector<1x32xf32>
    %cst_56 = arith.constant 1.280000e+02 : f32
    %110 = vector.broadcast %cst_56 : f32 to vector<1x32xf32>
    %111 = arith.divf %109, %110 : vector<1x32xf32>
    %cst_57 = arith.constant 9.99999974E-6 : f32
    %112 = vector.broadcast %cst_57 : f32 to vector<1x32xf32>
    %113 = arith.addf %111, %112 : vector<1x32xf32>
    %114 = math.rsqrt %113 : vector<1x32xf32>
    %115 = arith.mulf %98, %114 : vector<1x32xf32>
    %116 = arith.mulf %104, %115 : vector<1x32xf32>
    %117 = arith.subf %100, %116 : vector<1x32xf32>
    %118 = vector.broadcast %115 : vector<1x32xf32> to vector<128x32xf32>
    %119 = arith.mulf %96, %118 : vector<128x32xf32>
    %120 = vector.broadcast %117 : vector<1x32xf32> to vector<128x32xf32>
    %121 = arith.addf %119, %120 : vector<128x32xf32>
    %cst_58 = arith.constant 0.00999999977 : f32
    %122 = vector.broadcast %cst_58 : f32 to vector<128x32xf32>
    %123 = arith.mulf %122, %121 : vector<128x32xf32>
    %124 = arith.maximumf %121, %123 : vector<128x32xf32>
    %125 = arith.truncf %124 : vector<128x32xf32> to vector<128x32xbf16>
    %c0_59 = arith.constant 0 : index
    %c0_60 = arith.constant 0 : index
    %126 = vector.load %arg7[%c0_59, %c0_60] : memref<32x4xbf16, #tpu.memory_space<vmem>>, vector<32x4xbf16>
    %cst_61 = arith.constant dense<0.000000e+00> : vector<128x4xf32>
    %127 = tpu.matmul %125, %126, %cst_61 {dimension_numbers = #tpu.dot_dimension_numbers<[1], [0], [0], [1], [0, 0, 1, 1], [], []>} : vector<128x32xbf16>, vector<32x4xbf16>, vector<128x4xf32> -> vector<128x4xf32>
    %c0_62 = arith.constant 0 : index
    %c0_63 = arith.constant 0 : index
    %128 = vector.load %arg8[%c0_62, %c0_63] : memref<1x4xf32, #tpu.memory_space<vmem>>, vector<1x4xf32>
    %129 = vector.broadcast %128 : vector<1x4xf32> to vector<128x4xf32>
    %130 = arith.addf %127, %129 : vector<128x4xf32>
    %c0_64 = arith.constant 0 : index
    %c0_65 = arith.constant 0 : index
    %131 = vector.load %arg9[%c0_64, %c0_65] : memref<128x4xf32, #tpu.memory_space<vmem>>, vector<128x4xf32>
    tpu.vector_store %arg9[%c0_64, %c0_65], %130 {strides = array<i32>} : memref<128x4xf32, #tpu.memory_space<vmem>>, vector<128x4xf32>,
    return
  }
}

</mosaic_0001>

<bundles_post_ra>
// kernel: tpu_custom_call.1
= control target key start
LH: loop header
LB: loop body
LE: loop exit
PB: predicated region body
PF: predicated region fallthrough
CT: control target
= control target key end

     0   :  { %vm97_vm0 = vcmask 130048   ;;  %vm221_vm1 = vcmask 261120   ;;  %vm1578_vm2 = vcmask 31744   ;;  %s2609_s1 = inlined_call_operand.vmem [shape: bf16[16,32], index: 1, kind: input, shape index: {}]   ;;  %s2610_s0 = inlined_call_operand.vmem [shape: bf16[128,16], index: 0, kind: input, shape index: {}]   ;;  %s2611_s4 = inlined_call_operand.vmem [shape: bf16[3,32,32], index: 4, kind: input, shape index: {}]   ;;  %s2612_s2 = inlined_call_operand.vmem [shape: f32[1,32], index: 2, kind: input, shape index: {}]   ;;  %s2613_s3 = inlined_call_operand.vmem [shape: f32[1,32], index: 3, kind: input, shape index: {}]   ;;  %s2614_s5 = inlined_call_operand.vmem [shape: f32[3,1,32], index: 5, kind: input, shape index: {}]   ;;  %s2615_s6 = inlined_call_operand.vmem [shape: f32[3,1,32], index: 6, kind: input, shape index: {}]   ;;  %s2616_s7 = inlined_call_operand.vmem [shape: bf16[32,4], index: 7, kind: input, shape index: {}]   ;;  %s2617_s8 = inlined_call_operand.vmem [shape: f32[1,4], index: 8, kind: input, shape index: {}]   ;;  %s2618_s9 = inlined_call_operand.vmem [shape: f32[128,4], index: 9, kind: output, shape index: {}]  }
   0x1   :  { %v1818_v0 = vld [vmem:[%s2609_s1] sm:$0xff]   ;;  %v1820_v2 = vld [vmem:[%s2610_s0 + $0x8] sm:$0xff]   ;;  %v1821_v3 = vld [vmem:[%s2610_s0 + $0x10] sm:$0xff]  }
   0x2   :  { %v1819_v1 = vld [vmem:[%s2610_s0] sm:$0xff]   ;;  %1718 = vmatprep.subr.bf16.mxu0 %v1818_v0  ;;  %1816 = vmatprep.subr.bf16.mxu1 %v1818_v0  ;;  %v1824_v5 = vld [vmem:[%s2610_s0 + $0x28] sm:$0xff]   ;;  %v1825_v6 = vld [vmem:[%s2610_s0 + $0x30] sm:$0xff]  }
   0x3   :  { %1719 = vmatpush3.bf16.msra.mxu0 %v1818_v0  ;;  %1720 = vmatprep.mubr.msk.bf16.mxu0 %vm97_vm0, %v1819_v1  ;;  %v1823_v4 = vld [vmem:[%s2610_s0 + $0x20] sm:$0xff]   ;;  %v1822_v7 = vld [vmem:[%s2610_s0 + $0x18] sm:$0xff]   ;;  %v1828_v10 = vld [vmem:[%s2611_s4 + $0x8] sm:$0xff]  }
   0x4   :  { %1817 = vmatpush3.bf16.msra.mxu1 %v1818_v0  ;;  %1728 = vmatprep.mubr.msk.bf16.mxu1 %vm97_vm0, %v1823_v4  ;;  %v1826_v8 = vld [vmem:[%s2610_s0 + $0x38] sm:$0xff]   ;;  %v1827_v9 = vld [vmem:[%s2611_s4] sm:$0xff]  }
   0x5   :  { %1736 = vmatprep.subr.bf16.mxu1 %v1827_v9 }
   0x6   :  { %1721 = vmatmul.mubr.msk.bf16.vlgmr.msra.gmra.mrb[0].mxu0 %vm97_vm0, %v1820_v2 }
   0x7   :  { %1724 = vmatprep.mubr.msk.bf16.mxu0 %vm97_vm0, %v1821_v3  ;;  %1729 = vmatmul.mubr.msk.bf16.vlgmr.msra.gmra.mrb[0].mxu1 %vm97_vm0, %v1824_v5 }
   0x8   :  { %1732 = vmatprep.mubr.msk.bf16.mxu1 %vm97_vm0, %v1825_v6  ;;  %1737 = vmatpush3.bf16.msra.mxu1 %v1827_v9 }
   0x9   :  { %1738 = vmatprep.subr.bf16.mxu1 %v1828_v10 }
   0xc   :  { %1739 = vmatpush3.bf16.msra.mxu1 %v1828_v10 }
   0xe   :  { %1725 = vmatmul.mubr.msk.bf16.gmra.mrb[4].mxu0 %vm97_vm0, %v1822_v7 }
   0xf   :  { %1733 = vmatmul.mubr.msk.bf16.gmra.mrb[4].mxu1 %vm97_vm0, %v1826_v8 }
  0xd9   :  { %v1934_v11 = vpop.f32.mrb[0].mxu0 }
  0xda   :  { %v1936_v12 = vpop.f32.mrb[1].mxu0  ;;  %v1940_v14 = vpop.f32.mrb[0].mxu1  ;;  %v225_v22 = vsel %vm221_vm1, %v1934_v11, 0.0 }
  0xdb   :  { %v1938_v13 = vpop.f32.mrb[2].mxu0  ;;  %v1944_v16 = vpop.f32.mrb[1].mxu1  ;;  %v222_v17 = vsel %vm221_vm1, %v1936_v12, 0.0  ;;  %v241_v46 = vsel %vm221_vm1, %v1940_v14, 0.0 }
  0xdc   :  { %v1942_v15 = vpop.f32.mrb[3].mxu0  ;;  %v1950_v19 = vpop.f32.mrb[2].mxu1  ;;  %v227_v24 = vsel %vm221_vm1, %v1938_v13, 0.0  ;;  %v237_v41 = vsel %vm221_vm1, %v1944_v16, 0.0 }
  0xdd   :  { %v223_v18 = vsel %vm221_vm1, %v1942_v15, 0.0  ;;  %v1952_v21 = vpop.f32.mrb[3].mxu1  ;;  %v243_v48 = vsel %vm221_vm1, %v1950_v19, 0.0 }
  0xde   :  { %v224_v20 = vadd.f32 %v223_v18, %v222_v17  ;;  %v239_v44 = vsel %vm221_vm1, %v1952_v21, 0.0 }
  0xe0   :  { %v226_v23 = vadd.f32 %v225_v22, %v224_v20 }
  0xe1   :  { %v1958_v25 = vpop.f32.mrb[4].mxu0 }
  0xe2   :  { %v1960_v26 = vpop.f32.mrb[5].mxu0  ;;  %v228_v27 = vadd.f32 %v227_v24, %v226_v23  ;;  %v1966_v30 = vpop.f32.mrb[4].mxu1  ;;  %v233_v38 = vsel %vm221_vm1, %v1958_v25, 0.0 }
  0xe3   :  { %v229_v28 = vsel %vm221_vm1, %v1960_v26, 0.0  ;;  %v1964_v29 = vpop.f32.mrb[6].mxu0  ;;  %v1970_v33 = vpop.f32.mrb[5].mxu1  ;;  %v249_v54 = vsel %vm221_vm1, %v1966_v30, 0.0 }
  0xe4   :  { %v230_v31 = vadd.f32 %v229_v28, %v228_v27  ;;  %v1968_v32 = vpop.f32.mrb[7].mxu0  ;;  %v1974_v35 = vpop.f32.mrb[6].mxu1  ;;  %v235_v40 = vsel %vm221_vm1, %v1964_v29, 0.0  ;;  %v245_v49 = vsel %vm221_vm1, %v1970_v33, 0.0 }
  0xe5   :  { %v231_v34 = vsel %vm221_vm1, %v1968_v32, 0.0  ;;  %v1976_v37 = vpop.f32.mrb[7].mxu1  ;;  %v251_v56 = vsel %vm221_vm1, %v1974_v35, 0.0 }
  0xe6   :  { %v232_v36 = vadd.f32 %v231_v34, %v230_v31  ;;  %v247_v52 = vsel %vm221_vm1, %v1976_v37, 0.0 }
  0xe8   :  { %v234_v39 = vadd.f32 %v233_v38, %v232_v36 }
  0xea   :  { %v236_v42 = vadd.f32 %v235_v40, %v234_v39 }
  0xec   :  { %v238_v43 = vadd.f32 %v237_v41, %v236_v42 }
  0xee   :  { %v240_v45 = vadd.f32 %v239_v44, %v238_v43 }
  0xf0   :  { %v242_v47 = vadd.f32 %v241_v46, %v240_v45 }
  0xf2   :  { %v244_v50 = vadd.f32 %v243_v48, %v242_v47 }
  0xf4   :  { %v246_v51 = vadd.f32 %v245_v49, %v244_v50 }
  0xf6   :  { %v248_v53 = vadd.f32 %v247_v52, %v246_v51 }
  0xf8   :  { %v250_v55 = vadd.f32 %v249_v54, %v248_v53 }
  0xfa   :  { %v252_v57 = vadd.f32 %v251_v56, %v250_v55 }
  0xfc   :  { %v253_v58 = vrot.slane %v252_v57, 4 }
  0xfe   :  { %v254_v59 = vadd.f32 %v253_v58, %v252_v57 }
 0x100   :  { %v255_v60 = vrot.slane %v254_v59, 2 }
 0x102   :  { %v256_v61 = vadd.f32 %v255_v60, %v254_v59 }
 0x104   :  { %v257_v62 = vrot.slane %v256_v61, 1 }
 0x106   :  { %v258_v63 = vadd.f32 %v257_v62, %v256_v61 }
 0x108   :  { %v1998_v0 = vmul.f32 0.0078125, %v258_v63 }
 0x10a   :  { %v261_v1 = vsub.f32 %v1936_v12, %v1998_v0  ;;  %v262_v2 = vsub.f32 %v1942_v15, %v1998_v0  ;;  %v263_v3 = vsub.f32 %v1934_v11, %v1998_v0  ;;  %v264_v4 = vsub.f32 %v1938_v13, %v1998_v0 }
 0x10b   :  { %v265_v5 = vsub.f32 %v1960_v26, %v1998_v0  ;;  %v266_v6 = vsub.f32 %v1968_v32, %v1998_v0  ;;  %v267_v7 = vsub.f32 %v1958_v25, %v1998_v0  ;;  %v268_v8 = vsub.f32 %v1964_v29, %v1998_v0 }
 0x10c   :  { %v269_v9 = vsub.f32 %v1944_v16, %v1998_v0  ;;  %v270_v10 = vsub.f32 %v1952_v21, %v1998_v0  ;;  %v271_v17 = vsub.f32 %v1940_v14, %v1998_v0  ;;  %v272_v18 = vsub.f32 %v1950_v19, %v1998_v0 }
 0x10d   :  { %v273_v20 = vsub.f32 %v1970_v33, %v1998_v0  ;;  %v274_v22 = vsub.f32 %v1976_v37, %v1998_v0  ;;  %v275_v23 = vsub.f32 %v1966_v30, %v1998_v0  ;;  %v276_v24 = vsub.f32 %v1974_v35, %v1998_v0 }
 0x10e   :  { %v277_v27 = vmul.f32 %v261_v1, %v261_v1  ;;  %v278_v28 = vmul.f32 %v262_v2, %v262_v2  ;;  %v279_v31 = vmul.f32 %v263_v3, %v263_v3  ;;  %v280_v34 = vmul.f32 %v264_v4, %v264_v4 }
 0x10f   :  { %v281_v40 = vmul.f32 %v265_v5, %v265_v5  ;;  %v282_v43 = vmul.f32 %v266_v6, %v266_v6  ;;  %v283_v46 = vmul.f32 %v267_v7, %v267_v7  ;;  %v284_v49 = vmul.f32 %v268_v8, %v268_v8 }
 0x110   :  { %v293_v36 = vsel %vm221_vm1, %v277_v27, 0.0  ;;  %v294_v38 = vsel %vm221_vm1, %v278_v28, 0.0  ;;  %v296_v41 = vsel %vm221_vm1, %v279_v31, 0.0  ;;  %v298_v44 = vsel %vm221_vm1, %v280_v34, 0.0 }
 0x111   :  { %v295_v39 = vadd.f32 %v294_v38, %v293_v36  ;;  %v300_v47 = vsel %vm221_vm1, %v281_v40, 0.0  ;;  %v302_v50 = vsel %vm221_vm1, %v282_v43, 0.0  ;;  %v285_v52 = vmul.f32 %v269_v9, %v269_v9  ;;  %v219_v43 = vld [vmem:[%s2612_s2] sm:$0x1] }
 0x112   :  { %v304_v53 = vsel %vm221_vm1, %v283_v46, 0.0  ;;  %v286_v55 = vmul.f32 %v270_v10, %v270_v10  ;;  %v306_v56 = vsel %vm221_vm1, %v284_v49, 0.0  ;;  %v287_v58 = vmul.f32 %v271_v17, %v271_v17 }
 0x113   :  { %v297_v42 = vadd.f32 %v296_v41, %v295_v39  ;;  %v308_v59 = vsel %vm221_vm1, %v285_v52, 0.0  ;;  %v288_v61 = vmul.f32 %v272_v18, %v272_v18  ;;  %v289_v1 = vmul.f32 %v273_v20, %v273_v20 }
 0x114   :  { %v310_v62 = vsel %vm221_vm1, %v286_v55, 0.0  ;;  %v312_v2 = vsel %vm221_vm1, %v287_v58, 0.0  ;;  %v290_v4 = vmul.f32 %v274_v22, %v274_v22  ;;  %v291_v7 = vmul.f32 %v275_v23, %v275_v23 }
 0x115   :  { %v299_v45 = vadd.f32 %v298_v44, %v297_v42  ;;  %v314_v5 = vsel %vm221_vm1, %v288_v61, 0.0  ;;  %v316_v8 = vsel %vm221_vm1, %v289_v1, 0.0  ;;  %v292_v10 = vmul.f32 %v276_v24, %v276_v24 }
 0x116   :  { %v318_v17 = vsel %vm221_vm1, %v290_v4, 0.0  ;;  %v320_v18 = vsel %vm221_vm1, %v291_v7, 0.0  ;;  %v337_v42 = vlaneseq }
 0x117   :  { %v301_v48 = vadd.f32 %v300_v47, %v299_v45  ;;  %v322_v20 = vsel %vm221_vm1, %v292_v10, 0.0  ;;  %v220_v47 = vld [vmem:[%s2613_s3] sm:$0x1] }
 0x118   :  { %v338_v24 = vshrl.u32 %v337_v42, 7 }
 0x119   :  { %v303_v51 = vadd.f32 %v302_v50, %v301_v48 }
 0x11a   :  { %v2051_v44 = vsub.s32 0, %v338_v24 }
 0x11b   :  { %v305_v54 = vadd.f32 %v304_v53, %v303_v51 }
 0x11d   :  { %v307_v57 = vadd.f32 %v306_v56, %v305_v54 }
 0x11f   :  { %v309_v60 = vadd.f32 %v308_v59, %v307_v57 }
 0x121   :  { %v311_v63 = vadd.f32 %v310_v62, %v309_v60 }
 0x123   :  { %v313_v3 = vadd.f32 %v312_v2, %v311_v63 }
 0x125   :  { %v315_v6 = vadd.f32 %v314_v5, %v313_v3 }
 0x127   :  { %v317_v9 = vadd.f32 %v316_v8, %v315_v6 }
 0x129   :  { %v319_v27 = vadd.f32 %v318_v17, %v317_v9 }
 0x12b   :  { %v321_v28 = vadd.f32 %v320_v18, %v319_v27 }
 0x12d   :  { %v323_v31 = vadd.f32 %v322_v20, %v321_v28 }
 0x12f   :  { %v324_v34 = vrot.slane %v323_v31, 4 }
 0x131   :  { %v325_v36 = vadd.f32 %v324_v34, %v323_v31 }
 0x133   :  { %v326_v22 = vrot.slane %v325_v36, 2 }
 0x135   :  { %v327_v38 = vadd.f32 %v326_v22, %v325_v36 }
 0x137   :  { %v328_v39 = vrot.slane %v327_v38, 1 }
 0x139   :  { %v329_v40 = vadd.f32 %v328_v39, %v327_v38 }
 0x13b   :  { %v330_v23 = vmul.f32 0.0078125, %v329_v40 }
 0x13d   :  { %v331_v41 = vadd.f32 1e-05, %v330_v23 }
 0x13f   :  { %1835 = vrsqrt.f32 %v331_v41 }
 0x149   :  { %v1836_v45 = vpop.eup %1835 }
 0x14a   :  { %v333_v46 = vmul.f32 %v1836_v45, %v219_v43 }
 0x14c   :  { %v334_v48 = vmul.f32 %v333_v46, %v1998_v0  ;;  %v340_v49 = vrot.slane %v333_v46, %v2051_v44 }
 0x14e   :  { %v335_v50 = vsub.f32 %v220_v47, %v334_v48  ;;  %v355_v51 = vmul.f32 %v340_v49, %v1976_v37  ;;  %v342_v52 = vmul.f32 %v340_v49, %v1936_v12  ;;  %v343_v53 = vmul.f32 %v340_v49, %v1942_v15 }
 0x14f   :  { %v344_v54 = vmul.f32 %v1934_v11, %v340_v49  ;;  %v345_v55 = vmul.f32 %v1938_v13, %v340_v49  ;;  %v346_v56 = vmul.f32 %v340_v49, %v1960_v26  ;;  %v347_v57 = vmul.f32 %v340_v49, %v1968_v32 }
 0x150   :  { %v362_v58 = vrot.slane %v335_v50, %v2051_v44  ;;  %v348_v0 = vmul.f32 %v1958_v25, %v340_v49  ;;  %v349_v59 = vmul.f32 %v1964_v29, %v340_v49  ;;  %v350_v37 = vmul.f32 %v340_v49, %v1944_v16 }
 0x151   :  { %v351_v12 = vmul.f32 %v340_v49, %v1952_v21  ;;  %v352_v15 = vmul.f32 %v1940_v14, %v340_v49  ;;  %v353_v11 = vmul.f32 %v1950_v19, %v340_v49  ;;  %v354_v13 = vmul.f32 %v340_v49, %v1970_v33 }
 0x152   :  { %v377_v60 = vadd.f32 %v362_v58, %v355_v51  ;;  %v364_v26 = vadd.f32 %v362_v58, %v342_v52  ;;  %v365_v61 = vadd.f32 %v362_v58, %v343_v53  ;;  %v366_v32 = vadd.f32 %v362_v58, %v344_v54 }
 0x153   :  { %v367_v62 = vadd.f32 %v362_v58, %v345_v55  ;;  %v368_v63 = vadd.f32 %v362_v58, %v346_v56  ;;  %v369_v1 = vadd.f32 %v362_v58, %v347_v57  ;;  %v370_v25 = vadd.f32 %v362_v58, %v348_v0 }
 0x154   :  { %v380_v2 = vmul.f32 0.01, %v364_v26  ;;  %v381_v29 = vmul.f32 0.01, %v365_v61  ;;  %v371_v3 = vadd.f32 %v362_v58, %v349_v59  ;;  %v382_v16 = vmul.f32 0.01, %v366_v32 }
 0x155   :  { %v383_v4 = vmul.f32 0.01, %v367_v62  ;;  %v384_v21 = vmul.f32 0.01, %v368_v63  ;;  %v372_v5 = vadd.f32 %v362_v58, %v350_v37  ;;  %v393_v14 = vmul.f32 0.01, %v377_v60 }
 0x156   :  { %v396_v6 = vmax.f32 %v364_v26, %v380_v2  ;;  %v397_v19 = vmax.f32 %v365_v61, %v381_v29  ;;  %v385_v7 = vmul.f32 0.01, %v369_v1  ;;  %v398_v33 = vmax.f32 %v366_v32, %v382_v16 }
 0x157   :  { %v399_v8 = vmax.f32 %v367_v62, %v383_v4  ;;  %v400_v9 = vmax.f32 %v368_v63, %v384_v21  ;;  %v386_v10 = vmul.f32 0.01, %v370_v25  ;;  %v387_v18 = vmul.f32 0.01, %v371_v3 }
 0x158   :  { %v412_v17 = vpack.c.bf16 %v397_v19, %v396_v6  ;;  %v401_v27 = vmax.f32 %v369_v1, %v385_v7  ;;  %v373_v28 = vadd.f32 %v362_v58, %v351_v12  ;;  %v388_v34 = vmul.f32 0.01, %v372_v5 }
 0x159   :  { %v413_v20 = vpack.c.bf16 %v399_v8, %v398_v33  ;;  %v402_v31 = vmax.f32 %v370_v25, %v386_v10  ;;  %v374_v36 = vadd.f32 %v362_v58, %v352_v15  ;;  %v403_v38 = vmax.f32 %v371_v3, %v387_v18 }
 0x15a   :  { %1740 = vmatprep.mubr.msk.bf16.mxu1 %vm221_vm1, %v412_v17  ;;  %v414_v22 = vpack.c.bf16 %v401_v27, %v400_v9  ;;  %v389_v39 = vmul.f32 0.01, %v373_v28  ;;  %v375_v40 = vadd.f32 %v362_v58, %v353_v11  ;;  %v404_v23 = vmax.f32 %v372_v5, %v388_v34 }
 0x15b   :  { %1741 = vmatmul.mubr.msk.bf16.vlgmr.msra.gmra.mrb[8].mxu1 %vm221_vm1, %v413_v20  ;;  %v390_v41 = vmul.f32 0.01, %v374_v36  ;;  %v376_v42 = vadd.f32 %v362_v58, %v354_v13  ;;  %v356_v24 = vmul.f32 %v1966_v30, %v340_v49  ;;  %v415_v43 = vpack.c.bf16 %v403_v38, %v402_v31 }
 0x15c   :  { %1744 = vmatprep.mubr.msk.bf16.mxu1 %vm221_vm1, %v414_v22  ;;  %v405_v45 = vmax.f32 %v373_v28, %v389_v39  ;;  %v391_v46 = vmul.f32 0.01, %v375_v40  ;;  %v357_v47 = vmul.f32 %v1974_v35, %v340_v49  ;;  %v409_v48 = vmax.f32 %v377_v60, %v393_v14  ;;  %v1829_v35 = vld [vmem:[%s2611_s4 + $0x10] sm:$0xff]   ;;  %v1830_v49 = vld [vmem:[%s2611_s4 + $0x18] sm:$0xff]  }
 0x15d   :  { %v406_v50 = vmax.f32 %v374_v36, %v390_v41  ;;  %v392_v51 = vmul.f32 0.01, %v376_v42  ;;  %v378_v52 = vadd.f32 %v362_v58, %v356_v24  ;;  %1756 = vmatprep.subr.bf16.mxu0 %v1829_v35 }
 0x15e   :  { %v416_v53 = vpack.c.bf16 %v405_v45, %v404_v23  ;;  %v407_v54 = vmax.f32 %v375_v40, %v391_v46  ;;  %v379_v55 = vadd.f32 %v362_v58, %v357_v47  ;;  %1757 = vmatpush3.bf16.msra.mxu0 %v1829_v35 }
 0x15f   :  { %v408_v56 = vmax.f32 %v376_v42, %v392_v51  ;;  %v394_v57 = vmul.f32 0.01, %v378_v52  ;;  %1758 = vmatprep.subr.bf16.mxu0 %v1830_v49 }
 0x160   :  { %v417_v0 = vpack.c.bf16 %v407_v54, %v406_v50  ;;  %v395_v59 = vmul.f32 0.01, %v379_v55 }
 0x161   :  { %v418_v37 = vpack.c.bf16 %v409_v48, %v408_v56  ;;  %v410_v30 = vmax.f32 %v378_v52, %v394_v57 }
 0x162   :  { %v411_v12 = vmax.f32 %v379_v55, %v395_v59  ;;  %1759 = vmatpush3.bf16.msra.mxu0 %v1830_v49 }
 0x163   :  { %1745 = vmatmul.mubr.msk.bf16.gmra.mrb[12].mxu1 %vm221_vm1, %v415_v43 }
 0x164   :  { %1748 = vmatprep.mubr.msk.bf16.mxu1 %vm221_vm1, %v416_v53  ;;  %v419_v15 = vpack.c.bf16 %v411_v12, %v410_v30 }
 0x16b   :  { %1749 = vmatmul.mubr.msk.bf16.gmra.mrb[16].mxu1 %vm221_vm1, %v417_v0 }
 0x16c   :  { %1752 = vmatprep.mubr.msk.bf16.mxu1 %vm221_vm1, %v418_v37 }
 0x173   :  { %1753 = vmatmul.mubr.msk.bf16.gmra.mrb[20].mxu1 %vm221_vm1, %v419_v15 }
 0x22e   :  { %v2089_v58 = vpop.f32.mrb[8].mxu1 }
 0x22f   :  { %v2091_v11 = vpop.f32.mrb[9].mxu1  ;;  %v562_v62 = vsel %vm221_vm1, %v2089_v58, 0.0 }
 0x230   :  { %v2093_v13 = vpop.f32.mrb[10].mxu1  ;;  %v559_v26 = vsel %vm221_vm1, %v2091_v11, 0.0 }
 0x231   :  { %v2095_v60 = vpop.f32.mrb[11].mxu1  ;;  %v564_v1 = vsel %vm221_vm1, %v2093_v13, 0.0 }
 0x232   :  { %v560_v61 = vsel %vm221_vm1, %v2095_v60, 0.0 }
 0x233   :  { %v561_v32 = vadd.f32 %v560_v61, %v559_v26 }
 0x235   :  { %v563_v63 = vadd.f32 %v562_v62, %v561_v32 }
 0x236   :  { %v2105_v25 = vpop.f32.mrb[12].mxu1 }
 0x237   :  { %v2107_v2 = vpop.f32.mrb[13].mxu1  ;;  %v565_v29 = vadd.f32 %v564_v1, %v563_v63  ;;  %v570_v6 = vsel %vm221_vm1, %v2105_v25, 0.0 }
 0x238   :  { %v566_v3 = vsel %vm221_vm1, %v2107_v2, 0.0  ;;  %v2111_v16 = vpop.f32.mrb[14].mxu1 }
 0x239   :  { %v567_v4 = vadd.f32 %v566_v3, %v565_v29  ;;  %v2113_v21 = vpop.f32.mrb[15].mxu1  ;;  %v572_v7 = vsel %vm221_vm1, %v2111_v16, 0.0 }
 0x23a   :  { %v568_v5 = vsel %vm221_vm1, %v2113_v21, 0.0 }
 0x23b   :  { %v569_v14 = vadd.f32 %v568_v5, %v567_v4 }
 0x23d   :  { %v571_v19 = vadd.f32 %v570_v6, %v569_v14 }
 0x23e   :  { %v2121_v33 = vpop.f32.mrb[16].mxu1 }
 0x23f   :  { %v2123_v8 = vpop.f32.mrb[17].mxu1  ;;  %v573_v9 = vadd.f32 %v572_v7, %v571_v19  ;;  %v578_v31 = vsel %vm221_vm1, %v2121_v33, 0.0 }
 0x240   :  { %v574_v10 = vsel %vm221_vm1, %v2123_v8, 0.0  ;;  %v2127_v17 = vpop.f32.mrb[18].mxu1 }
 0x241   :  { %v575_v27 = vadd.f32 %v574_v10, %v573_v9  ;;  %v2129_v18 = vpop.f32.mrb[19].mxu1  ;;  %v580_v36 = vsel %vm221_vm1, %v2127_v17, 0.0 }
 0x242   :  { %v576_v28 = vsel %vm221_vm1, %v2129_v18, 0.0 }
 0x243   :  { %v577_v20 = vadd.f32 %v576_v28, %v575_v27 }
 0x245   :  { %v579_v34 = vadd.f32 %v578_v31, %v577_v20 }
 0x246   :  { %v2137_v22 = vpop.f32.mrb[20].mxu1 }
 0x247   :  { %v2139_v38 = vpop.f32.mrb[21].mxu1  ;;  %v581_v39 = vadd.f32 %v580_v36, %v579_v34  ;;  %v586_v45 = vsel %vm221_vm1, %v2137_v22, 0.0 }
 0x248   :  { %v582_v40 = vsel %vm221_vm1, %v2139_v38, 0.0  ;;  %v2143_v23 = vpop.f32.mrb[22].mxu1 }
 0x249   :  { %v583_v41 = vadd.f32 %v582_v40, %v581_v39  ;;  %v2145_v42 = vpop.f32.mrb[23].mxu1  ;;  %v588_v47 = vsel %vm221_vm1, %v2143_v23, 0.0 }
 0x24a   :  { %v584_v24 = vsel %vm221_vm1, %v2145_v42, 0.0 }
 0x24b   :  { %v585_v43 = vadd.f32 %v584_v24, %v583_v41 }
 0x24d   :  { %v587_v46 = vadd.f32 %v586_v45, %v585_v43 }
 0x24f   :  { %v589_v48 = vadd.f32 %v588_v47, %v587_v46 }
 0x251   :  { %v590_v50 = vrot.slane %v589_v48, 4 }
 0x253   :  { %v591_v51 = vadd.f32 %v590_v50, %v589_v48 }
 0x255   :  { %v592_v52 = vrot.slane %v591_v51, 2 }
 0x257   :  { %v593_v53 = vadd.f32 %v592_v52, %v591_v51 }
 0x259   :  { %v594_v54 = vrot.slane %v593_v53, 1 }
 0x25b   :  { %v595_v55 = vadd.f32 %v594_v54, %v593_v53 }
 0x25d   :  { %v2153_v56 = vmul.f32 0.0078125, %v595_v55 }
 0x25f   :  { %v597_v57 = vsub.f32 %v2091_v11, %v2153_v56  ;;  %v598_v0 = vsub.f32 %v2095_v60, %v2153_v56  ;;  %v599_v59 = vsub.f32 %v2089_v58, %v2153_v56  ;;  %v600_v37 = vsub.f32 %v2093_v13, %v2153_v56 }
 0x260   :  { %v601_v30 = vsub.f32 %v2107_v2, %v2153_v56  ;;  %v602_v12 = vsub.f32 %v2113_v21, %v2153_v56  ;;  %v603_v15 = vsub.f32 %v2105_v25, %v2153_v56  ;;  %v604_v35 = vsub.f32 %v2111_v16, %v2153_v56 }
 0x261   :  { %v605_v49 = vsub.f32 %v2123_v8, %v2153_v56  ;;  %v606_v26 = vsub.f32 %v2129_v18, %v2153_v56  ;;  %v607_v61 = vsub.f32 %v2121_v33, %v2153_v56  ;;  %v608_v32 = vsub.f32 %v2127_v17, %v2153_v56 }
 0x262   :  { %v609_v62 = vsub.f32 %v2139_v38, %v2153_v56  ;;  %v610_v63 = vsub.f32 %v2145_v42, %v2153_v56  ;;  %v611_v1 = vsub.f32 %v2137_v22, %v2153_v56  ;;  %v612_v29 = vsub.f32 %v2143_v23, %v2153_v56 }
 0x263   :  { %v613_v3 = vmul.f32 %v597_v57, %v597_v57  ;;  %v614_v4 = vmul.f32 %v598_v0, %v598_v0  ;;  %v615_v5 = vmul.f32 %v599_v59, %v599_v59  ;;  %v616_v14 = vmul.f32 %v600_v37, %v600_v37 }
 0x264   :  { %v617_v9 = vmul.f32 %v601_v30, %v601_v30  ;;  %v618_v28 = vmul.f32 %v602_v12, %v602_v12  ;;  %v619_v34 = vmul.f32 %v603_v15, %v603_v15  ;;  %v620_v40 = vmul.f32 %v604_v35, %v604_v35 }
 0x265   :  { %v629_v6 = vsel %vm221_vm1, %v613_v3, 0.0  ;;  %v630_v19 = vsel %vm221_vm1, %v614_v4, 0.0  ;;  %v632_v10 = vsel %vm221_vm1, %v615_v5, 0.0  ;;  %v634_v20 = vsel %vm221_vm1, %v616_v14, 0.0 }
 0x266   :  { %v631_v7 = vadd.f32 %v630_v19, %v629_v6  ;;  %v636_v36 = vsel %vm221_vm1, %v617_v9, 0.0  ;;  %v638_v41 = vsel %vm221_vm1, %v618_v28, 0.0  ;;  %v621_v43 = vmul.f32 %v605_v49, %v605_v49 }
 0x267   :  { %v640_v45 = vsel %vm221_vm1, %v619_v34, 0.0  ;;  %v622_v47 = vmul.f32 %v606_v26, %v606_v26  ;;  %v642_v48 = vsel %vm221_vm1, %v620_v40, 0.0  ;;  %v623_v51 = vmul.f32 %v607_v61, %v607_v61 }
 0x268   :  { %v633_v27 = vadd.f32 %v632_v10, %v631_v7  ;;  %v644_v52 = vsel %vm221_vm1, %v621_v43, 0.0  ;;  %v624_v54 = vmul.f32 %v608_v32, %v608_v32  ;;  %v625_v0 = vmul.f32 %v609_v62, %v609_v62 }
 0x269   :  { %v646_v55 = vsel %vm221_vm1, %v622_v47, 0.0  ;;  %v648_v59 = vsel %vm221_vm1, %v623_v51, 0.0  ;;  %v626_v30 = vmul.f32 %v610_v63, %v610_v63  ;;  %v627_v35 = vmul.f32 %v611_v1, %v611_v1 }
 0x26a   :  { %v635_v31 = vadd.f32 %v634_v20, %v633_v27  ;;  %v650_v12 = vsel %vm221_vm1, %v624_v54, 0.0  ;;  %v652_v49 = vsel %vm221_vm1, %v625_v0, 0.0  ;;  %v628_v61 = vmul.f32 %v612_v29, %v612_v29  ;;  %v557_v29 = vld [vmem:[%s2614_s5] sm:$0x1] }
 0x26b   :  { %v654_v3 = vsel %vm221_vm1, %v626_v30, 0.0  ;;  %v656_v32 = vsel %vm221_vm1, %v627_v35, 0.0 }
 0x26c   :  { %v637_v39 = vadd.f32 %v636_v36, %v635_v31  ;;  %v658_v62 = vsel %vm221_vm1, %v628_v61, 0.0  ;;  %v558_v31 = vld [vmem:[%s2615_s6] sm:$0x1] }
 0x26e   :  { %v639_v24 = vadd.f32 %v638_v41, %v637_v39 }
 0x270   :  { %v641_v46 = vadd.f32 %v640_v45, %v639_v24 }
 0x272   :  { %v643_v50 = vadd.f32 %v642_v48, %v641_v46 }
 0x274   :  { %v645_v53 = vadd.f32 %v644_v52, %v643_v50 }
 0x276   :  { %v647_v57 = vadd.f32 %v646_v55, %v645_v53 }
 0x278   :  { %v649_v37 = vadd.f32 %v648_v59, %v647_v57 }
 0x27a   :  { %v651_v15 = vadd.f32 %v650_v12, %v649_v37 }
 0x27c   :  { %v653_v26 = vadd.f32 %v652_v49, %v651_v15 }
 0x27e   :  { %v655_v4 = vadd.f32 %v654_v3, %v653_v26 }
 0x280   :  { %v657_v5 = vadd.f32 %v656_v32, %v655_v4 }
 0x282   :  { %v659_v14 = vadd.f32 %v658_v62, %v657_v5 }
 0x284   :  { %v660_v6 = vrot.slane %v659_v14, 4 }
 0x286   :  { %v661_v19 = vadd.f32 %v660_v6, %v659_v14 }
 0x288   :  { %v662_v63 = vrot.slane %v661_v19, 2 }
 0x28a   :  { %v663_v7 = vadd.f32 %v662_v63, %v661_v19 }
 0x28c   :  { %v664_v9 = vrot.slane %v663_v7, 1 }
 0x28e   :  { %v665_v10 = vadd.f32 %v664_v9, %v663_v7 }
 0x290   :  { %v666_v1 = vmul.f32 0.0078125, %v665_v10 }
 0x292   :  { %v667_v27 = vadd.f32 1e-05, %v666_v1 }
 0x294   :  { %1837 = vrsqrt.f32 %v667_v27 }
 0x29e   :  { %v1838_v28 = vpop.eup %1837 }
 0x29f   :  { %v669_v20 = vmul.f32 %v1838_v28, %v557_v29 }
 0x2a1   :  { %v670_v34 = vmul.f32 %v669_v20, %v2153_v56  ;;  %v676_v36 = vrot.slane %v669_v20, %v2051_v44 }
 0x2a3   :  { %v671_v39 = vsub.f32 %v558_v31, %v670_v34  ;;  %v691_v40 = vmul.f32 %v676_v36, %v2145_v42  ;;  %v678_v41 = vmul.f32 %v676_v36, %v2091_v11  ;;  %v679_v24 = vmul.f32 %v676_v36, %v2095_v60 }
 0x2a4   :  { %v680_v43 = vmul.f32 %v2089_v58, %v676_v36  ;;  %v681_v45 = vmul.f32 %v2093_v13, %v676_v36  ;;  %v682_v46 = vmul.f32 %v676_v36, %v2107_v2  ;;  %v683_v47 = vmul.f32 %v676_v36, %v2113_v21 }
 0x2a5   :  { %v698_v48 = vrot.slane %v671_v39, %v2051_v44  ;;  %v684_v56 = vmul.f32 %v2105_v25, %v676_v36  ;;  %v685_v50 = vmul.f32 %v2111_v16, %v676_v36  ;;  %v686_v42 = vmul.f32 %v676_v36, %v2123_v8 }
 0x2a6   :  { %v687_v11 = vmul.f32 %v676_v36, %v2129_v18  ;;  %v688_v60 = vmul.f32 %v2121_v33, %v676_v36  ;;  %v689_v58 = vmul.f32 %v2127_v17, %v676_v36  ;;  %v690_v13 = vmul.f32 %v676_v36, %v2139_v38 }
 0x2a7   :  { %v713_v51 = vadd.f32 %v698_v48, %v691_v40  ;;  %v700_v2 = vadd.f32 %v698_v48, %v678_v41  ;;  %v701_v52 = vadd.f32 %v698_v48, %v679_v24  ;;  %v702_v21 = vadd.f32 %v698_v48, %v680_v43 }
 0x2a8   :  { %v703_v53 = vadd.f32 %v698_v48, %v681_v45  ;;  %v704_v54 = vadd.f32 %v698_v48, %v682_v46  ;;  %v705_v55 = vadd.f32 %v698_v48, %v683_v47  ;;  %v706_v25 = vadd.f32 %v698_v48, %v684_v56 }
 0x2a9   :  { %v716_v57 = vmul.f32 0.01, %v700_v2  ;;  %v717_v16 = vmul.f32 0.01, %v701_v52  ;;  %v707_v0 = vadd.f32 %v698_v48, %v685_v50  ;;  %v718_v8 = vmul.f32 0.01, %v702_v21 }
 0x2aa   :  { %v719_v59 = vmul.f32 0.01, %v703_v53  ;;  %v720_v18 = vmul.f32 0.01, %v704_v54  ;;  %v708_v37 = vadd.f32 %v698_v48, %v686_v42  ;;  %v729_v33 = vmul.f32 0.01, %v713_v51 }
 0x2ab   :  { %v732_v30 = vmax.f32 %v700_v2, %v716_v57  ;;  %v733_v17 = vmax.f32 %v701_v52, %v717_v16  ;;  %v721_v12 = vmul.f32 0.01, %v705_v55  ;;  %v734_v38 = vmax.f32 %v702_v21, %v718_v8 }
 0x2ac   :  { %v735_v15 = vmax.f32 %v703_v53, %v719_v59  ;;  %v736_v35 = vmax.f32 %v704_v54, %v720_v18  ;;  %v722_v49 = vmul.f32 0.01, %v706_v25  ;;  %v723_v3 = vmul.f32 0.01, %v707_v0 }
 0x2ad   :  { %v748_v26 = vpack.c.bf16 %v733_v17, %v732_v30  ;;  %v737_v61 = vmax.f32 %v705_v55, %v721_v12  ;;  %v709_v4 = vadd.f32 %v698_v48, %v687_v11  ;;  %v724_v62 = vmul.f32 0.01, %v708_v37 }
 0x2ae   :  { %v749_v32 = vpack.c.bf16 %v735_v15, %v734_v38  ;;  %v738_v5 = vmax.f32 %v706_v25, %v722_v49  ;;  %v710_v14 = vadd.f32 %v698_v48, %v688_v60  ;;  %v739_v19 = vmax.f32 %v707_v0, %v723_v3 }
 0x2af   :  { %1760 = vmatprep.mubr.msk.bf16.mxu0 %vm221_vm1, %v748_v26  ;;  %v750_v6 = vpack.c.bf16 %v737_v61, %v736_v35  ;;  %v725_v63 = vmul.f32 0.01, %v709_v4  ;;  %v711_v7 = vadd.f32 %v698_v48, %v689_v58  ;;  %v740_v9 = vmax.f32 %v708_v37, %v724_v62 }
 0x2b0   :  { %1761 = vmatmul.mubr.msk.bf16.vlgmr.msra.gmra.mrb[8].mxu0 %vm221_vm1, %v749_v32  ;;  %v726_v10 = vmul.f32 0.01, %v710_v14  ;;  %v712_v1 = vadd.f32 %v698_v48, %v690_v13  ;;  %v692_v27 = vmul.f32 %v2137_v22, %v676_v36  ;;  %v751_v29 = vpack.c.bf16 %v739_v19, %v738_v5 }
 0x2b1   :  { %1764 = vmatprep.mubr.msk.bf16.mxu0 %vm221_vm1, %v750_v6  ;;  %v741_v28 = vmax.f32 %v709_v4, %v725_v63  ;;  %v727_v20 = vmul.f32 0.01, %v711_v7  ;;  %v693_v31 = vmul.f32 %v2143_v23, %v676_v36  ;;  %v745_v34 = vmax.f32 %v713_v51, %v729_v33  ;;  %v1831_v23 = vld [vmem:[%s2611_s4 + $0x20] sm:$0xff]   ;;  %v1832_v36 = vld [vmem:[%s2611_s4 + $0x28] sm:$0xff]  }
 0x2b2   :  { %v742_v39 = vmax.f32 %v710_v14, %v726_v10  ;;  %v728_v40 = vmul.f32 0.01, %v712_v1  ;;  %v714_v41 = vadd.f32 %v698_v48, %v692_v27  ;;  %1776 = vmatprep.subr.bf16.mxu1 %v1831_v23 }
 0x2b3   :  { %v752_v24 = vpack.c.bf16 %v741_v28, %v740_v9  ;;  %v743_v43 = vmax.f32 %v711_v7, %v727_v20  ;;  %v715_v45 = vadd.f32 %v698_v48, %v693_v31  ;;  %1777 = vmatpush3.bf16.msra.mxu1 %v1831_v23 }
 0x2b4   :  { %v744_v46 = vmax.f32 %v712_v1, %v728_v40  ;;  %v730_v47 = vmul.f32 0.01, %v714_v41  ;;  %1778 = vmatprep.subr.bf16.mxu1 %v1832_v36 }
 0x2b5   :  { %v753_v56 = vpack.c.bf16 %v743_v43, %v742_v39  ;;  %v731_v50 = vmul.f32 0.01, %v715_v45 }
 0x2b6   :  { %v754_v42 = vpack.c.bf16 %v745_v34, %v744_v46  ;;  %v746_v22 = vmax.f32 %v714_v41, %v730_v47 }
 0x2b7   :  { %v747_v11 = vmax.f32 %v715_v45, %v731_v50  ;;  %1779 = vmatpush3.bf16.msra.mxu1 %v1832_v36 }
 0x2b8   :  { %1765 = vmatmul.mubr.msk.bf16.gmra.mrb[12].mxu0 %vm221_vm1, %v751_v29 }
 0x2b9   :  { %1768 = vmatprep.mubr.msk.bf16.mxu0 %vm221_vm1, %v752_v24  ;;  %v755_v60 = vpack.c.bf16 %v747_v11, %v746_v22 }
 0x2c0   :  { %1769 = vmatmul.mubr.msk.bf16.gmra.mrb[16].mxu0 %vm221_vm1, %v753_v56 }
 0x2c1   :  { %1772 = vmatprep.mubr.msk.bf16.mxu0 %vm221_vm1, %v754_v42 }
 0x2c8   :  { %1773 = vmatmul.mubr.msk.bf16.gmra.mrb[20].mxu0 %vm221_vm1, %v755_v60 }
 0x383   :  { %v2242_v48 = vpop.f32.mrb[8].mxu0 }
 0x384   :  { %v2244_v58 = vpop.f32.mrb[9].mxu0  ;;  %v901_v53 = vsel %vm221_vm1, %v2242_v48, 0.0 }
 0x385   :  { %v2246_v13 = vpop.f32.mrb[10].mxu0  ;;  %v898_v2 = vsel %vm221_vm1, %v2244_v58, 0.0 }
 0x386   :  { %v2248_v51 = vpop.f32.mrb[11].mxu0  ;;  %v903_v55 = vsel %vm221_vm1, %v2246_v13, 0.0 }
 0x387   :  { %v899_v52 = vsel %vm221_vm1, %v2248_v51, 0.0 }
 0x388   :  { %v900_v21 = vadd.f32 %v899_v52, %v898_v2 }
 0x38a   :  { %v902_v54 = vadd.f32 %v901_v53, %v900_v21 }
 0x38b   :  { %v2258_v25 = vpop.f32.mrb[12].mxu0 }
 0x38c   :  { %v2260_v57 = vpop.f32.mrb[13].mxu0  ;;  %v904_v16 = vadd.f32 %v903_v55, %v902_v54  ;;  %v909_v30 = vsel %vm221_vm1, %v2258_v25, 0.0 }
 0x38d   :  { %v905_v0 = vsel %vm221_vm1, %v2260_v57, 0.0  ;;  %v2264_v8 = vpop.f32.mrb[14].mxu0 }
 0x38e   :  { %v906_v59 = vadd.f32 %v905_v0, %v904_v16  ;;  %v2266_v18 = vpop.f32.mrb[15].mxu0  ;;  %v911_v12 = vsel %vm221_vm1, %v2264_v8, 0.0 }
 0x38f   :  { %v907_v37 = vsel %vm221_vm1, %v2266_v18, 0.0 }
 0x390   :  { %v908_v33 = vadd.f32 %v907_v37, %v906_v59 }
 0x392   :  { %v910_v17 = vadd.f32 %v909_v30, %v908_v33 }
 0x393   :  { %v2274_v38 = vpop.f32.mrb[16].mxu0 }
 0x394   :  { %v2276_v15 = vpop.f32.mrb[17].mxu0  ;;  %v912_v35 = vadd.f32 %v911_v12, %v910_v17  ;;  %v917_v5 = vsel %vm221_vm1, %v2274_v38, 0.0 }
 0x395   :  { %v913_v49 = vsel %vm221_vm1, %v2276_v15, 0.0  ;;  %v2280_v26 = vpop.f32.mrb[18].mxu0 }
 0x396   :  { %v914_v61 = vadd.f32 %v913_v49, %v912_v35  ;;  %v2282_v3 = vpop.f32.mrb[19].mxu0  ;;  %v919_v14 = vsel %vm221_vm1, %v2280_v26, 0.0 }
 0x397   :  { %v915_v4 = vsel %vm221_vm1, %v2282_v3, 0.0 }
 0x398   :  { %v916_v32 = vadd.f32 %v915_v4, %v914_v61 }
 0x39a   :  { %v918_v62 = vadd.f32 %v917_v5, %v916_v32 }
 0x39b   :  { %v2290_v6 = vpop.f32.mrb[20].mxu0 }
 0x39c   :  { %v2292_v19 = vpop.f32.mrb[21].mxu0  ;;  %v920_v63 = vadd.f32 %v919_v14, %v918_v62  ;;  %v925_v28 = vsel %vm221_vm1, %v2290_v6, 0.0 }
 0x39d   :  { %v921_v7 = vsel %vm221_vm1, %v2292_v19, 0.0  ;;  %v2296_v9 = vpop.f32.mrb[22].mxu0 }
 0x39e   :  { %v922_v10 = vadd.f32 %v921_v7, %v920_v63  ;;  %v2298_v1 = vpop.f32.mrb[23].mxu0  ;;  %v927_v31 = vsel %vm221_vm1, %v2296_v9, 0.0 }
 0x39f   :  { %v923_v27 = vsel %vm221_vm1, %v2298_v1, 0.0 }
 0x3a0   :  { %v924_v29 = vadd.f32 %v923_v27, %v922_v10 }
 0x3a2   :  { %v926_v20 = vadd.f32 %v925_v28, %v924_v29 }
 0x3a4   :  { %v928_v34 = vadd.f32 %v927_v31, %v926_v20 }
 0x3a6   :  { %v929_v39 = vrot.slane %v928_v34, 4 }
 0x3a8   :  { %v930_v40 = vadd.f32 %v929_v39, %v928_v34 }
 0x3aa   :  { %v931_v41 = vrot.slane %v930_v40, 2 }
 0x3ac   :  { %v932_v24 = vadd.f32 %v931_v41, %v930_v40 }
 0x3ae   :  { %v933_v43 = vrot.slane %v932_v24, 1 }
 0x3b0   :  { %v934_v45 = vadd.f32 %v933_v43, %v932_v24 }
 0x3b2   :  { %v2306_v46 = vmul.f32 0.0078125, %v934_v45 }
 0x3b4   :  { %v936_v47 = vsub.f32 %v2244_v58, %v2306_v46  ;;  %v937_v56 = vsub.f32 %v2248_v51, %v2306_v46  ;;  %v938_v50 = vsub.f32 %v2242_v48, %v2306_v46  ;;  %v939_v42 = vsub.f32 %v2246_v13, %v2306_v46 }
 0x3b5   :  { %v940_v22 = vsub.f32 %v2260_v57, %v2306_v46  ;;  %v941_v11 = vsub.f32 %v2266_v18, %v2306_v46  ;;  %v942_v60 = vsub.f32 %v2258_v25, %v2306_v46  ;;  %v943_v23 = vsub.f32 %v2264_v8, %v2306_v46 }
 0x3b6   :  { %v944_v36 = vsub.f32 %v2276_v15, %v2306_v46  ;;  %v945_v2 = vsub.f32 %v2282_v3, %v2306_v46  ;;  %v946_v52 = vsub.f32 %v2274_v38, %v2306_v46  ;;  %v947_v21 = vsub.f32 %v2280_v26, %v2306_v46 }
 0x3b7   :  { %v948_v53 = vsub.f32 %v2292_v19, %v2306_v46  ;;  %v949_v54 = vsub.f32 %v2298_v1, %v2306_v46  ;;  %v950_v55 = vsub.f32 %v2290_v6, %v2306_v46  ;;  %v951_v16 = vsub.f32 %v2296_v9, %v2306_v46 }
 0x3b8   :  { %v952_v0 = vmul.f32 %v936_v47, %v936_v47  ;;  %v953_v59 = vmul.f32 %v937_v56, %v937_v56  ;;  %v954_v37 = vmul.f32 %v938_v50, %v938_v50  ;;  %v955_v33 = vmul.f32 %v939_v42, %v939_v42 }
 0x3b9   :  { %v956_v35 = vmul.f32 %v940_v22, %v940_v22  ;;  %v957_v4 = vmul.f32 %v941_v11, %v941_v11  ;;  %v958_v62 = vmul.f32 %v942_v60, %v942_v60  ;;  %v959_v7 = vmul.f32 %v943_v23, %v943_v23 }
 0x3ba   :  { %v968_v30 = vsel %vm221_vm1, %v952_v0, 0.0  ;;  %v969_v17 = vsel %vm221_vm1, %v953_v59, 0.0  ;;  %v971_v49 = vsel %vm221_vm1, %v954_v37, 0.0  ;;  %v973_v32 = vsel %vm221_vm1, %v955_v33, 0.0 }
 0x3bb   :  { %v970_v12 = vadd.f32 %v969_v17, %v968_v30  ;;  %v975_v14 = vsel %vm221_vm1, %v956_v35, 0.0  ;;  %v977_v10 = vsel %vm221_vm1, %v957_v4, 0.0  ;;  %v960_v29 = vmul.f32 %v944_v36, %v944_v36 }
 0x3bc   :  { %v979_v28 = vsel %vm221_vm1, %v958_v62, 0.0  ;;  %v961_v31 = vmul.f32 %v945_v2, %v945_v2  ;;  %v981_v34 = vsel %vm221_vm1, %v959_v7, 0.0  ;;  %v962_v40 = vmul.f32 %v946_v52, %v946_v52 }
 0x3bd   :  { %v972_v61 = vadd.f32 %v971_v49, %v970_v12  ;;  %v983_v41 = vsel %vm221_vm1, %v960_v29, 0.0  ;;  %v963_v43 = vmul.f32 %v947_v21, %v947_v21  ;;  %v964_v56 = vmul.f32 %v948_v53, %v948_v53 }
 0x3be   :  { %v985_v45 = vsel %vm221_vm1, %v961_v31, 0.0  ;;  %v987_v50 = vsel %vm221_vm1, %v962_v40, 0.0  ;;  %v965_v22 = vmul.f32 %v949_v54, %v949_v54  ;;  %v966_v23 = vmul.f32 %v950_v55, %v950_v55 }
 0x3bf   :  { %v974_v5 = vadd.f32 %v973_v32, %v972_v61  ;;  %v989_v11 = vsel %vm221_vm1, %v963_v43, 0.0  ;;  %v991_v36 = vsel %vm221_vm1, %v964_v56, 0.0  ;;  %v967_v52 = vmul.f32 %v951_v16, %v951_v16  ;;  %v1640_v16 = vld [vmem:[%s2614_s5 + $0x1] sm:$0x1] }
 0x3c0   :  { %v993_v0 = vsel %vm221_vm1, %v965_v22, 0.0  ;;  %v995_v21 = vsel %vm221_vm1, %v966_v23, 0.0 }
 0x3c1   :  { %v976_v63 = vadd.f32 %v975_v14, %v974_v5  ;;  %v997_v53 = vsel %vm221_vm1, %v967_v52, 0.0  ;;  %v1641_v5 = vld [vmem:[%s2615_s6 + $0x1] sm:$0x1] }
 0x3c3   :  { %v978_v27 = vadd.f32 %v977_v10, %v976_v63 }
 0x3c5   :  { %v980_v20 = vadd.f32 %v979_v28, %v978_v27 }
 0x3c7   :  { %v982_v39 = vadd.f32 %v981_v34, %v980_v20 }
 0x3c9   :  { %v984_v24 = vadd.f32 %v983_v41, %v982_v39 }
 0x3cb   :  { %v986_v47 = vadd.f32 %v985_v45, %v984_v24 }
 0x3cd   :  { %v988_v42 = vadd.f32 %v987_v50, %v986_v47 }
 0x3cf   :  { %v990_v60 = vadd.f32 %v989_v11, %v988_v42 }
 0x3d1   :  { %v992_v2 = vadd.f32 %v991_v36, %v990_v60 }
 0x3d3   :  { %v994_v59 = vadd.f32 %v993_v0, %v992_v2 }
 0x3d5   :  { %v996_v37 = vadd.f32 %v995_v21, %v994_v59 }
 0x3d7   :  { %v998_v33 = vadd.f32 %v997_v53, %v996_v37 }
 0x3d9   :  { %v999_v30 = vrot.slane %v998_v33, 4 }
 0x3db   :  { %v1000_v17 = vadd.f32 %v999_v30, %v998_v33 }
 0x3dd   :  { %v1001_v54 = vrot.slane %v1000_v17, 2 }
 0x3df   :  { %v1002_v12 = vadd.f32 %v1001_v54, %v1000_v17 }
 0x3e1   :  { %v1003_v35 = vrot.slane %v1002_v12, 1 }
 0x3e3   :  { %v1004_v49 = vadd.f32 %v1003_v35, %v1002_v12 }
 0x3e5   :  { %v1005_v55 = vmul.f32 0.0078125, %v1004_v49 }
 0x3e7   :  { %v1006_v61 = vadd.f32 1e-05, %v1005_v55 }
 0x3e9   :  { %1839 = vrsqrt.f32 %v1006_v61 }
 0x3f3   :  { %v1840_v4 = vpop.eup %1839 }
 0x3f4   :  { %v1008_v32 = vmul.f32 %v1840_v4, %v1640_v16 }
 0x3f6   :  { %v1009_v62 = vmul.f32 %v1008_v32, %v2306_v46  ;;  %v1015_v14 = vrot.slane %v1008_v32, %v2051_v44 }
 0x3f8   :  { %v1010_v63 = vsub.f32 %v1641_v5, %v1009_v62  ;;  %v1030_v7 = vmul.f32 %v1015_v14, %v2298_v1  ;;  %v1017_v10 = vmul.f32 %v1015_v14, %v2244_v58  ;;  %v1018_v27 = vmul.f32 %v1015_v14, %v2248_v51 }
 0x3f9   :  { %v1019_v29 = vmul.f32 %v2242_v48, %v1015_v14  ;;  %v1020_v28 = vmul.f32 %v2246_v13, %v1015_v14  ;;  %v1021_v20 = vmul.f32 %v1015_v14, %v2260_v57  ;;  %v1022_v31 = vmul.f32 %v1015_v14, %v2266_v18 }
 0x3fa   :  { %v1037_v34 = vrot.slane %v1010_v63, %v2051_v44  ;;  %v1023_v46 = vmul.f32 %v2258_v25, %v1015_v14  ;;  %v1024_v39 = vmul.f32 %v2264_v8, %v1015_v14  ;;  %v1025_v1 = vmul.f32 %v1015_v14, %v2276_v15 }
 0x3fb   :  { %v1026_v58 = vmul.f32 %v1015_v14, %v2282_v3  ;;  %v1027_v51 = vmul.f32 %v2274_v38, %v1015_v14  ;;  %v1028_v48 = vmul.f32 %v2280_v26, %v1015_v14  ;;  %v1029_v13 = vmul.f32 %v1015_v14, %v2292_v19 }
 0x3fc   :  { %v1052_v40 = vadd.f32 %v1037_v34, %v1030_v7  ;;  %v1039_v57 = vadd.f32 %v1037_v34, %v1017_v10  ;;  %v1040_v41 = vadd.f32 %v1037_v34, %v1018_v27  ;;  %v1041_v18 = vadd.f32 %v1037_v34, %v1019_v29 }
 0x3fd   :  { %v1042_v24 = vadd.f32 %v1037_v34, %v1020_v28  ;;  %v1043_v43 = vadd.f32 %v1037_v34, %v1021_v20  ;;  %v1044_v45 = vadd.f32 %v1037_v34, %v1022_v31  ;;  %v1045_v25 = vadd.f32 %v1037_v34, %v1023_v46 }
 0x3fe   :  { %v1055_v47 = vmul.f32 0.01, %v1039_v57  ;;  %v1056_v8 = vmul.f32 0.01, %v1040_v41  ;;  %v1046_v56 = vadd.f32 %v1037_v34, %v1024_v39  ;;  %v1057_v15 = vmul.f32 0.01, %v1041_v18 }
 0x3ff   :  { %v1058_v50 = vmul.f32 0.01, %v1042_v24  ;;  %v1059_v3 = vmul.f32 0.01, %v1043_v43  ;;  %v1047_v42 = vadd.f32 %v1037_v34, %v1025_v1  ;;  %v1068_v38 = vmul.f32 0.01, %v1052_v40 }
 0x400   :  { %v1071_v22 = vmax.f32 %v1039_v57, %v1055_v47  ;;  %v1072_v26 = vmax.f32 %v1040_v41, %v1056_v8  ;;  %v1060_v11 = vmul.f32 0.01, %v1044_v45  ;;  %v1073_v19 = vmax.f32 %v1041_v18, %v1057_v15 }
 0x401   :  { %v1074_v60 = vmax.f32 %v1042_v24, %v1058_v50  ;;  %v1075_v23 = vmax.f32 %v1043_v43, %v1059_v3  ;;  %v1061_v36 = vmul.f32 0.01, %v1045_v25  ;;  %v1062_v0 = vmul.f32 0.01, %v1046_v56 }
 0x402   :  { %v1087_v2 = vpack.c.bf16 %v1072_v26, %v1071_v22  ;;  %v1076_v52 = vmax.f32 %v1044_v45, %v1060_v11  ;;  %v1048_v59 = vadd.f32 %v1037_v34, %v1026_v58  ;;  %v1063_v53 = vmul.f32 0.01, %v1047_v42 }
 0x403   :  { %v1088_v21 = vpack.c.bf16 %v1074_v60, %v1073_v19  ;;  %v1077_v37 = vmax.f32 %v1045_v25, %v1061_v36  ;;  %v1049_v33 = vadd.f32 %v1037_v34, %v1027_v51  ;;  %v1078_v17 = vmax.f32 %v1046_v56, %v1062_v0 }
 0x404   :  { %1780 = vmatprep.mubr.msk.bf16.mxu1 %vm221_vm1, %v1087_v2  ;;  %v1089_v30 = vpack.c.bf16 %v1076_v52, %v1075_v23  ;;  %v1064_v54 = vmul.f32 0.01, %v1048_v59  ;;  %v1050_v12 = vadd.f32 %v1037_v34, %v1028_v48  ;;  %v1079_v35 = vmax.f32 %v1047_v42, %v1063_v53 }
 0x405   :  { %1781 = vmatmul.mubr.msk.bf16.vlgmr.msra.gmra.mrb[24].mxu1 %vm221_vm1, %v1088_v21  ;;  %v1065_v49 = vmul.f32 0.01, %v1049_v33  ;;  %v1051_v55 = vadd.f32 %v1037_v34, %v1029_v13  ;;  %v1031_v61 = vmul.f32 %v2290_v6, %v1015_v14  ;;  %v1090_v16 = vpack.c.bf16 %v1078_v17, %v1077_v37  ;;  %v1834_v13 = vld [vmem:[%s2616_s7 + $0x8] sm:$0xff]  }
 0x406   :  { %1784 = vmatprep.mubr.msk.bf16.mxu1 %vm221_vm1, %v1089_v30  ;;  %v1080_v4 = vmax.f32 %v1048_v59, %v1064_v54  ;;  %v1066_v32 = vmul.f32 0.01, %v1050_v12  ;;  %v1032_v5 = vmul.f32 %v2296_v9, %v1015_v14  ;;  %v1084_v62 = vmax.f32 %v1052_v40, %v1068_v38  ;;  %v1833_v14 = vld [vmem:[%s2616_s7] sm:$0xff]  }
 0x407   :  { %v1081_v63 = vmax.f32 %v1049_v33, %v1065_v49  ;;  %v1067_v7 = vmul.f32 0.01, %v1051_v55  ;;  %v1053_v10 = vadd.f32 %v1037_v34, %v1031_v61  ;;  %1796 = vmatprep.subr.bf16.mxu0 %v1833_v14 }
 0x408   :  { %v1091_v27 = vpack.c.bf16 %v1080_v4, %v1079_v35  ;;  %v1082_v29 = vmax.f32 %v1050_v12, %v1066_v32  ;;  %v1054_v28 = vadd.f32 %v1037_v34, %v1032_v5  ;;  %1797 = vmatpush3.bf16.msra.mxu0 %v1833_v14 }
 0x409   :  { %v1083_v20 = vmax.f32 %v1051_v55, %v1067_v7  ;;  %v1069_v31 = vmul.f32 0.01, %v1053_v10  ;;  %1798 = vmatprep.subr.bf16.mxu0 %v1834_v13 }
 0x40a   :  { %v1092_v46 = vpack.c.bf16 %v1082_v29, %v1081_v63  ;;  %v1070_v39 = vmul.f32 0.01, %v1054_v28 }
 0x40b   :  { %v1093_v1 = vpack.c.bf16 %v1084_v62, %v1083_v20  ;;  %v1085_v6 = vmax.f32 %v1053_v10, %v1069_v31 }
 0x40c   :  { %v1086_v58 = vmax.f32 %v1054_v28, %v1070_v39  ;;  %1799 = vmatpush3.bf16.msra.mxu0 %v1834_v13 }
 0x40d   :  { %1785 = vmatmul.mubr.msk.bf16.gmra.mrb[28].mxu1 %vm221_vm1, %v1090_v16 }
 0x40e   :  { %1788 = vmatprep.mubr.msk.bf16.mxu1 %vm221_vm1, %v1091_v27  ;;  %v1094_v51 = vpack.c.bf16 %v1086_v58, %v1085_v6 }
 0x415   :  { %1789 = vmatmul.mubr.msk.bf16.gmra.mrb[32].mxu1 %vm221_vm1, %v1092_v46 }
 0x416   :  { %1792 = vmatprep.mubr.msk.bf16.mxu1 %vm221_vm1, %v1093_v1 }
 0x41d   :  { %1793 = vmatmul.mubr.msk.bf16.gmra.mrb[36].mxu1 %vm221_vm1, %v1094_v51 }
 0x4d8   :  { %v2389_v9 = vpop.f32.mrb[24].mxu1 }
 0x4d9   :  { %v2394_v34 = vpop.f32.mrb[25].mxu1  ;;  %v1240_v24 = vsel %vm221_vm1, %v2389_v9, 0.0 }
 0x4da   :  { %v2396_v48 = vpop.f32.mrb[26].mxu1  ;;  %v1237_v57 = vsel %vm221_vm1, %v2394_v34, 0.0 }
 0x4db   :  { %v2401_v40 = vpop.f32.mrb[27].mxu1  ;;  %v1242_v45 = vsel %vm221_vm1, %v2396_v48, 0.0 }
 0x4dc   :  { %v1238_v41 = vsel %vm221_vm1, %v2401_v40, 0.0 }
 0x4dd   :  { %v1239_v18 = vadd.f32 %v1238_v41, %v1237_v57 }
 0x4df   :  { %v1241_v43 = vadd.f32 %v1240_v24, %v1239_v18 }
 0x4e0   :  { %v2411_v25 = vpop.f32.mrb[28].mxu1 }
 0x4e1   :  { %v2413_v47 = vpop.f32.mrb[29].mxu1  ;;  %v1243_v8 = vadd.f32 %v1242_v45, %v1241_v43  ;;  %v1248_v22 = vsel %vm221_vm1, %v2411_v25, 0.0 }
 0x4e2   :  { %v1244_v56 = vsel %vm221_vm1, %v2413_v47, 0.0  ;;  %v2417_v15 = vpop.f32.mrb[30].mxu1 }
 0x4e3   :  { %v1245_v50 = vadd.f32 %v1244_v56, %v1243_v8  ;;  %v2419_v3 = vpop.f32.mrb[31].mxu1  ;;  %v1250_v11 = vsel %vm221_vm1, %v2417_v15, 0.0 }
 0x4e4   :  { %v1246_v42 = vsel %vm221_vm1, %v2419_v3, 0.0 }
 0x4e5   :  { %v1247_v38 = vadd.f32 %v1246_v42, %v1245_v50 }
 0x4e7   :  { %v1249_v26 = vadd.f32 %v1248_v22, %v1247_v38 }
 0x4e8   :  { %v2427_v19 = vpop.f32.mrb[32].mxu1 }
 0x4e9   :  { %v2429_v60 = vpop.f32.mrb[33].mxu1  ;;  %v1251_v23 = vadd.f32 %v1250_v11, %v1249_v26  ;;  %v1256_v37 = vsel %vm221_vm1, %v2427_v19, 0.0 }
 0x4ea   :  { %v1252_v36 = vsel %vm221_vm1, %v2429_v60, 0.0  ;;  %v2433_v2 = vpop.f32.mrb[34].mxu1 }
 0x4eb   :  { %v1253_v52 = vadd.f32 %v1252_v36, %v1251_v23  ;;  %v2435_v0 = vpop.f32.mrb[35].mxu1  ;;  %v1258_v33 = vsel %vm221_vm1, %v2433_v2, 0.0 }
 0x4ec   :  { %v1254_v59 = vsel %vm221_vm1, %v2435_v0, 0.0 }
 0x4ed   :  { %v1255_v21 = vadd.f32 %v1254_v59, %v1253_v52 }
 0x4ef   :  { %v1257_v53 = vadd.f32 %v1256_v37, %v1255_v21 }
 0x4f0   :  { %v2443_v30 = vpop.f32.mrb[36].mxu1 }
 0x4f1   :  { %v2445_v17 = vpop.f32.mrb[37].mxu1  ;;  %v1259_v54 = vadd.f32 %v1258_v33, %v1257_v53  ;;  %v1264_v4 = vsel %vm221_vm1, %v2443_v30, 0.0 }
 0x4f2   :  { %v1260_v12 = vsel %vm221_vm1, %v2445_v17, 0.0  ;;  %v2449_v35 = vpop.f32.mrb[38].mxu1 }
 0x4f3   :  { %v1261_v49 = vadd.f32 %v1260_v12, %v1259_v54  ;;  %v2451_v55 = vpop.f32.mrb[39].mxu1  ;;  %v1266_v5 = vsel %vm221_vm1, %v2449_v35, 0.0 }
 0x4f4   :  { %v1262_v61 = vsel %vm221_vm1, %v2451_v55, 0.0 }
 0x4f5   :  { %v1263_v16 = vadd.f32 %v1262_v61, %v1261_v49 }
 0x4f7   :  { %v1265_v32 = vadd.f32 %v1264_v4, %v1263_v16 }
 0x4f9   :  { %v1267_v62 = vadd.f32 %v1266_v5, %v1265_v32 }
 0x4fb   :  { %v1268_v63 = vrot.slane %v1267_v62, 4 }
 0x4fd   :  { %v1269_v7 = vadd.f32 %v1268_v63, %v1267_v62 }
 0x4ff   :  { %v1270_v10 = vrot.slane %v1269_v7, 2 }
 0x501   :  { %v1271_v27 = vadd.f32 %v1270_v10, %v1269_v7 }
 0x503   :  { %v1272_v29 = vrot.slane %v1271_v27, 1 }
 0x505   :  { %v1273_v28 = vadd.f32 %v1272_v29, %v1271_v27 }
 0x507   :  { %v2459_v20 = vmul.f32 0.0078125, %v1273_v28 }
 0x509   :  { %v1275_v31 = vsub.f32 %v2394_v34, %v2459_v20  ;;  %v1276_v46 = vsub.f32 %v2401_v40, %v2459_v20  ;;  %v1277_v39 = vsub.f32 %v2389_v9, %v2459_v20  ;;  %v1278_v1 = vsub.f32 %v2396_v48, %v2459_v20 }
 0x50a   :  { %v1279_v6 = vsub.f32 %v2413_v47, %v2459_v20  ;;  %v1280_v58 = vsub.f32 %v2419_v3, %v2459_v20  ;;  %v1281_v51 = vsub.f32 %v2411_v25, %v2459_v20  ;;  %v1282_v14 = vsub.f32 %v2417_v15, %v2459_v20 }
 0x50b   :  { %v1283_v13 = vsub.f32 %v2429_v60, %v2459_v20  ;;  %v1284_v57 = vsub.f32 %v2435_v0, %v2459_v20  ;;  %v1285_v41 = vsub.f32 %v2427_v19, %v2459_v20  ;;  %v1286_v18 = vsub.f32 %v2433_v2, %v2459_v20 }
 0x50c   :  { %v1287_v24 = vsub.f32 %v2445_v17, %v2459_v20  ;;  %v1288_v43 = vsub.f32 %v2451_v55, %v2459_v20  ;;  %v1289_v45 = vsub.f32 %v2443_v30, %v2459_v20  ;;  %v1290_v8 = vsub.f32 %v2449_v35, %v2459_v20 }
 0x50d   :  { %v1291_v56 = vmul.f32 %v1275_v31, %v1275_v31  ;;  %v1292_v50 = vmul.f32 %v1276_v46, %v1276_v46  ;;  %v1293_v42 = vmul.f32 %v1277_v39, %v1277_v39  ;;  %v1294_v38 = vmul.f32 %v1278_v1, %v1278_v1 }
 0x50e   :  { %v1295_v23 = vmul.f32 %v1279_v6, %v1279_v6  ;;  %v1296_v59 = vmul.f32 %v1280_v58, %v1280_v58  ;;  %v1297_v53 = vmul.f32 %v1281_v51, %v1281_v51  ;;  %v1298_v12 = vmul.f32 %v1282_v14, %v1282_v14 }
 0x50f   :  { %v1307_v22 = vsel %vm221_vm1, %v1291_v56, 0.0  ;;  %v1308_v26 = vsel %vm221_vm1, %v1292_v50, 0.0  ;;  %v1310_v36 = vsel %vm221_vm1, %v1293_v42, 0.0  ;;  %v1312_v21 = vsel %vm221_vm1, %v1294_v38, 0.0 }
 0x510   :  { %v1309_v11 = vadd.f32 %v1308_v26, %v1307_v22  ;;  %v1314_v33 = vsel %vm221_vm1, %v1295_v23, 0.0  ;;  %v1316_v49 = vsel %vm221_vm1, %v1296_v59, 0.0  ;;  %v1299_v16 = vmul.f32 %v1283_v13, %v1283_v13 }
 0x511   :  { %v1318_v4 = vsel %vm221_vm1, %v1297_v53, 0.0  ;;  %v1300_v5 = vmul.f32 %v1284_v57, %v1284_v57  ;;  %v1320_v62 = vsel %vm221_vm1, %v1298_v12, 0.0  ;;  %v1301_v7 = vmul.f32 %v1285_v41, %v1285_v41 }
 0x512   :  { %v1311_v52 = vadd.f32 %v1310_v36, %v1309_v11  ;;  %v1322_v10 = vsel %vm221_vm1, %v1299_v16, 0.0  ;;  %v1302_v29 = vmul.f32 %v1286_v18, %v1286_v18  ;;  %v1303_v46 = vmul.f32 %v1287_v24, %v1287_v24 }
 0x513   :  { %v1324_v28 = vsel %vm221_vm1, %v1300_v5, 0.0  ;;  %v1326_v39 = vsel %vm221_vm1, %v1301_v7, 0.0  ;;  %v1304_v6 = vmul.f32 %v1288_v43, %v1288_v43  ;;  %v1305_v14 = vmul.f32 %v1289_v45, %v1289_v45 }
 0x514   :  { %v1313_v37 = vadd.f32 %v1312_v21, %v1311_v52  ;;  %v1328_v58 = vsel %vm221_vm1, %v1302_v29, 0.0  ;;  %v1330_v13 = vsel %vm221_vm1, %v1303_v46, 0.0  ;;  %v1306_v41 = vmul.f32 %v1290_v8, %v1290_v8  ;;  %v1656_v8 = vld [vmem:[%s2614_s5 + $0x2] sm:$0x1] }
 0x515   :  { %v1332_v56 = vsel %vm221_vm1, %v1304_v6, 0.0  ;;  %v1334_v18 = vsel %vm221_vm1, %v1305_v14, 0.0 }
 0x516   :  { %v1315_v54 = vadd.f32 %v1314_v33, %v1313_v37  ;;  %v1336_v24 = vsel %vm221_vm1, %v1306_v41, 0.0  ;;  %v1657_v37 = vld [vmem:[%s2615_s6 + $0x2] sm:$0x1] }
 0x518   :  { %v1317_v61 = vadd.f32 %v1316_v49, %v1315_v54 }
 0x51a   :  { %v1319_v32 = vadd.f32 %v1318_v4, %v1317_v61 }
 0x51c   :  { %v1321_v63 = vadd.f32 %v1320_v62, %v1319_v32 }
 0x51e   :  { %v1323_v27 = vadd.f32 %v1322_v10, %v1321_v63 }
 0x520   :  { %v1325_v31 = vadd.f32 %v1324_v28, %v1323_v27 }
 0x522   :  { %v1327_v1 = vadd.f32 %v1326_v39, %v1325_v31 }
 0x524   :  { %v1329_v51 = vadd.f32 %v1328_v58, %v1327_v1 }
 0x526   :  { %v1331_v57 = vadd.f32 %v1330_v13, %v1329_v51 }
 0x528   :  { %v1333_v50 = vadd.f32 %v1332_v56, %v1331_v57 }
 0x52a   :  { %v1335_v42 = vadd.f32 %v1334_v18, %v1333_v50 }
 0x52c   :  { %v1337_v38 = vadd.f32 %v1336_v24, %v1335_v42 }
 0x52e   :  { %v1338_v22 = vrot.slane %v1337_v38, 4 }
 0x530   :  { %v1339_v26 = vadd.f32 %v1338_v22, %v1337_v38 }
 0x532   :  { %v1340_v43 = vrot.slane %v1339_v26, 2 }
 0x534   :  { %v1341_v11 = vadd.f32 %v1340_v43, %v1339_v26 }
 0x536   :  { %v1342_v23 = vrot.slane %v1341_v11, 1 }
 0x538   :  { %v1343_v36 = vadd.f32 %v1342_v23, %v1341_v11 }
 0x53a   :  { %v1344_v45 = vmul.f32 0.0078125, %v1343_v36 }
 0x53c   :  { %v1345_v52 = vadd.f32 1e-05, %v1344_v45 }
 0x53e   :  { %1841 = vrsqrt.f32 %v1345_v52 }
 0x548   :  { %v1842_v59 = vpop.eup %1841 }
 0x549   :  { %v1347_v21 = vmul.f32 %v1842_v59, %v1656_v8 }
 0x54b   :  { %v1348_v53 = vmul.f32 %v1347_v21, %v2459_v20  ;;  %v1354_v33 = vrot.slane %v1347_v21, %v2051_v44 }
 0x54d   :  { %v1349_v54 = vsub.f32 %v1657_v37, %v1348_v53  ;;  %v1369_v12 = vmul.f32 %v1354_v33, %v2451_v55  ;;  %v1356_v49 = vmul.f32 %v1354_v33, %v2394_v34  ;;  %v1357_v61 = vmul.f32 %v1354_v33, %v2401_v40 }
 0x54e   :  { %v1358_v16 = vmul.f32 %v2389_v9, %v1354_v33  ;;  %v1359_v4 = vmul.f32 %v2396_v48, %v1354_v33  ;;  %v1360_v32 = vmul.f32 %v1354_v33, %v2413_v47  ;;  %v1361_v5 = vmul.f32 %v1354_v33, %v2419_v3 }
 0x54f   :  { %v1376_v62 = vrot.slane %v1349_v54, %v2051_v44  ;;  %v1362_v20 = vmul.f32 %v2411_v25, %v1354_v33  ;;  %v1363_v63 = vmul.f32 %v2417_v15, %v1354_v33  ;;  %v1364_v55 = vmul.f32 %v1354_v33, %v2429_v60 }
 0x550   :  { %v1365_v34 = vmul.f32 %v1354_v33, %v2435_v0  ;;  %v1366_v40 = vmul.f32 %v2427_v19, %v1354_v33  ;;  %v1367_v9 = vmul.f32 %v2433_v2, %v1354_v33  ;;  %v1368_v48 = vmul.f32 %v1354_v33, %v2445_v17 }
 0x551   :  { %v1391_v7 = vadd.f32 %v1376_v62, %v1369_v12  ;;  %v1378_v47 = vadd.f32 %v1376_v62, %v1356_v49  ;;  %v1379_v10 = vadd.f32 %v1376_v62, %v1357_v61  ;;  %v1380_v3 = vadd.f32 %v1376_v62, %v1358_v16 }
 0x552   :  { %v1381_v27 = vadd.f32 %v1376_v62, %v1359_v4  ;;  %v1382_v44 = vadd.f32 %v1376_v62, %v1360_v32  ;;  %v1383_v29 = vadd.f32 %v1376_v62, %v1361_v5  ;;  %v1384_v25 = vadd.f32 %v1376_v62, %v1362_v20 }
 0x553   :  { %v1394_v28 = vmul.f32 0.01, %v1378_v47  ;;  %v1395_v15 = vmul.f32 0.01, %v1379_v10  ;;  %v1385_v31 = vadd.f32 %v1376_v62, %v1363_v63  ;;  %v1396_v60 = vmul.f32 0.01, %v1380_v3 }
 0x554   :  { %v1397_v46 = vmul.f32 0.01, %v1381_v27  ;;  %v1398_v0 = vmul.f32 0.01, %v1382_v44  ;;  %v1386_v39 = vadd.f32 %v1376_v62, %v1364_v55  ;;  %v1407_v19 = vmul.f32 0.01, %v1391_v7 }
 0x555   :  { %v1410_v1 = vmax.f32 %v1378_v47, %v1394_v28  ;;  %v1411_v2 = vmax.f32 %v1379_v10, %v1395_v15  ;;  %v1399_v6 = vmul.f32 0.01, %v1383_v29  ;;  %v1412_v17 = vmax.f32 %v1380_v3, %v1396_v60 }
 0x556   :  { %v1413_v58 = vmax.f32 %v1381_v27, %v1397_v46  ;;  %v1414_v51 = vmax.f32 %v1382_v44, %v1398_v0  ;;  %v1400_v14 = vmul.f32 0.01, %v1384_v25  ;;  %v1401_v41 = vmul.f32 0.01, %v1385_v31 }
 0x557   :  { %v1426_v13 = vpack.c.bf16 %v1411_v2, %v1410_v1  ;;  %v1415_v57 = vmax.f32 %v1383_v29, %v1399_v6  ;;  %v1387_v56 = vadd.f32 %v1376_v62, %v1365_v34  ;;  %v1402_v42 = vmul.f32 0.01, %v1386_v39 }
 0x558   :  { %v1427_v50 = vpack.c.bf16 %v1413_v58, %v1412_v17  ;;  %v1416_v18 = vmax.f32 %v1384_v25, %v1400_v14  ;;  %v1388_v24 = vadd.f32 %v1376_v62, %v1366_v40  ;;  %v1417_v22 = vmax.f32 %v1385_v31, %v1401_v41 }
 0x559   :  { %1800 = vmatprep.mubr.msk.bf16.mxu0 %vm221_vm1, %v1426_v13  ;;  %v1428_v38 = vpack.c.bf16 %v1415_v57, %v1414_v51  ;;  %v1403_v26 = vmul.f32 0.01, %v1387_v56  ;;  %v1389_v43 = vadd.f32 %v1376_v62, %v1367_v9  ;;  %v1418_v11 = vmax.f32 %v1386_v39, %v1402_v42 }
 0x55a   :  { %1801 = vmatmul.mubr.msk.bf16.vlgmr.msra.gmra.mrb[24].mxu0 %vm221_vm1, %v1427_v50  ;;  %v1404_v23 = vmul.f32 0.01, %v1388_v24  ;;  %v1390_v36 = vadd.f32 %v1376_v62, %v1368_v48  ;;  %v1370_v45 = vmul.f32 %v2443_v30, %v1354_v33  ;;  %v1429_v52 = vpack.c.bf16 %v1417_v22, %v1416_v18 }
 0x55b   :  { %1804 = vmatprep.mubr.msk.bf16.mxu0 %vm221_vm1, %v1428_v38  ;;  %v1419_v8 = vmax.f32 %v1387_v56, %v1403_v26  ;;  %v1405_v59 = vmul.f32 0.01, %v1389_v43  ;;  %v1371_v21 = vmul.f32 %v2449_v35, %v1354_v33  ;;  %v1423_v37 = vmax.f32 %v1391_v7, %v1407_v19  ;;  %v1658_v35 = vld [vmem:[%s2617_s8] ss:$0 sm:$0xff] }
 0x55c   :  { %v1420_v53 = vmax.f32 %v1388_v24, %v1404_v23  ;;  %v1406_v54 = vmul.f32 0.01, %v1390_v36  ;;  %v1392_v12 = vadd.f32 %v1376_v62, %v1370_v45 }
 0x55d   :  { %v1430_v49 = vpack.c.bf16 %v1419_v8, %v1418_v11  ;;  %v1421_v61 = vmax.f32 %v1389_v43, %v1405_v59  ;;  %v1393_v16 = vadd.f32 %v1376_v62, %v1371_v21 }
 0x55e   :  { %v1422_v4 = vmax.f32 %v1390_v36, %v1406_v54  ;;  %v1408_v32 = vmul.f32 0.01, %v1392_v12 }
 0x55f   :  { %v1431_v5 = vpack.c.bf16 %v1421_v61, %v1420_v53  ;;  %v1409_v20 = vmul.f32 0.01, %v1393_v16 }
 0x560   :  { %v1432_v63 = vpack.c.bf16 %v1423_v37, %v1422_v4  ;;  %v1424_v30 = vmax.f32 %v1392_v12, %v1408_v32 }
 0x561   :  { %v1425_v55 = vmax.f32 %v1393_v16, %v1409_v20 }
 0x562   :  { %1805 = vmatmul.mubr.msk.bf16.gmra.mrb[28].mxu0 %vm221_vm1, %v1429_v52 }
 0x563   :  { %1808 = vmatprep.mubr.msk.bf16.mxu0 %vm221_vm1, %v1430_v49  ;;  %v1433_v34 = vpack.c.bf16 %v1425_v55, %v1424_v30 }
 0x56a   :  { %1809 = vmatmul.mubr.msk.bf16.gmra.mrb[32].mxu0 %vm221_vm1, %v1431_v5 }
 0x56b   :  { %1812 = vmatprep.mubr.msk.bf16.mxu0 %vm221_vm1, %v1432_v63 }
 0x572   :  { %1813 = vmatmul.mubr.msk.bf16.gmra.mrb[36].mxu0 %vm221_vm1, %v1433_v34 }
 0x62d   :  { %v1802_v33 = vpop.f32.mrb[24].mxu0 }
 0x62e   :  { %v1524_v62 = vadd.f32 %v1802_v33, %v1658_v35  ;;  %v1515_v40 = vpop.f32.mrb[25].mxu0 }
 0x62f   :  { %v1516_v9 = vadd.f32 %v1658_v35, %v1515_v40  ;;  %v1803_v48 = vpop.f32.mrb[26].mxu0 }
 0x630   :  { %1581 = vst.msk [vmem:[%s2618_s9 + $0x10] sm:$0xff] %vm1578_vm2, %v1524_v62  ;;  %v1527_v7 = vadd.f32 %v1803_v48, %v1658_v35  ;;  %v1518_v47 = vpop.f32.mrb[27].mxu0 }
 0x631   :  { %1579 = vst.msk [vmem:[%s2618_s9] sm:$0xff] %vm1578_vm2, %v1516_v9  ;;  %v1519_v10 = vadd.f32 %v1658_v35, %v1518_v47 }
 0x632   :  { %1582 = vst.msk [vmem:[%s2618_s9 + $0x18] sm:$0xff] %vm1578_vm2, %v1527_v7 }
 0x633   :  { %1580 = vst.msk [vmem:[%s2618_s9 + $0x8] sm:$0xff] %vm1578_vm2, %v1519_v10 }
 0x635   :  { %v1806_v3 = vpop.f32.mrb[28].mxu0 }
 0x636   :  { %v1540_v27 = vadd.f32 %v1806_v3, %v1658_v35  ;;  %v1531_v44 = vpop.f32.mrb[29].mxu0 }
 0x637   :  { %v1532_v29 = vadd.f32 %v1658_v35, %v1531_v44  ;;  %v1807_v25 = vpop.f32.mrb[30].mxu0 }
 0x638   :  { %1585 = vst.msk [vmem:[%s2618_s9 + $0x30] sm:$0xff] %vm1578_vm2, %v1540_v27  ;;  %v1543_v28 = vadd.f32 %v1807_v25, %v1658_v35  ;;  %v1534_v15 = vpop.f32.mrb[31].mxu0 }
 0x639   :  { %1583 = vst.msk [vmem:[%s2618_s9 + $0x20] sm:$0xff] %vm1578_vm2, %v1532_v29  ;;  %v1535_v31 = vadd.f32 %v1658_v35, %v1534_v15 }
 0x63a   :  { %1586 = vst.msk [vmem:[%s2618_s9 + $0x38] sm:$0xff] %vm1578_vm2, %v1543_v28 }
 0x63b   :  { %1584 = vst.msk [vmem:[%s2618_s9 + $0x28] sm:$0xff] %vm1578_vm2, %v1535_v31 }
 0x63d   :  { %v1810_v60 = vpop.f32.mrb[32].mxu0 }
 0x63e   :  { %v1556_v46 = vadd.f32 %v1810_v60, %v1658_v35  ;;  %v1547_v0 = vpop.f32.mrb[33].mxu0 }
 0x63f   :  { %v1548_v39 = vadd.f32 %v1658_v35, %v1547_v0  ;;  %v1811_v19 = vpop.f32.mrb[34].mxu0 }
 0x640   :  { %1589 = vst.msk [vmem:[%s2618_s9 + $0x50] sm:$0xff] %vm1578_vm2, %v1556_v46  ;;  %v1559_v1 = vadd.f32 %v1811_v19, %v1658_v35  ;;  %v1550_v2 = vpop.f32.mrb[35].mxu0 }
 0x641   :  { %1587 = vst.msk [vmem:[%s2618_s9 + $0x40] sm:$0xff] %vm1578_vm2, %v1548_v39  ;;  %v1551_v6 = vadd.f32 %v1658_v35, %v1550_v2 }
 0x642   :  { %1590 = vst.msk [vmem:[%s2618_s9 + $0x58] sm:$0xff] %vm1578_vm2, %v1559_v1 }
 0x643   :  { %1588 = vst.msk [vmem:[%s2618_s9 + $0x48] sm:$0xff] %vm1578_vm2, %v1551_v6 }
 0x645   :  { %v1814_v17 = vpop.f32.mrb[36].mxu0 }
 0x646   :  { %v1572_v58 = vadd.f32 %v1814_v17, %v1658_v35  ;;  %v1563_v51 = vpop.f32.mrb[37].mxu0 }
 0x647   :  { %v1564_v14 = vadd.f32 %v1658_v35, %v1563_v51  ;;  %v1815_v13 = vpop.f32.mrb[38].mxu0 }
 0x648   :  { %1593 = vst.msk [vmem:[%s2618_s9 + $0x70] sm:$0xff] %vm1578_vm2, %v1572_v58  ;;  %v1575_v57 = vadd.f32 %v1815_v13, %v1658_v35  ;;  %v1566_v41 = vpop.f32.mrb[39].mxu0 }
 0x649   :  { %1591 = vst.msk [vmem:[%s2618_s9 + $0x60] sm:$0xff] %vm1578_vm2, %v1564_v14  ;;  %v1567_v56 = vadd.f32 %v1658_v35, %v1566_v41 }
 0x64a   :  { %1594 = vst.msk [vmem:[%s2618_s9 + $0x78] sm:$0xff] %vm1578_vm2, %v1575_v57 }
 0x64b   :  { %1592 = vst.msk [vmem:[%s2618_s9 + $0x68] sm:$0xff] %vm1578_vm2, %v1567_v56 }

</bundles_post_ra>
